<compile_context>
chip_gen: v7x
topology: tpu7x:2x2x1
jax: 0.10.0
libtpu: 0.0.40
codegen_flags: <defaults>
</compile_context>

<pallas_src>
import jax
import jax.numpy as jnp
from jax.experimental import pallas as pl
from jax.experimental.pallas import tpu as pltpu

H = 14
W = 14
CIN = 128
COUT = 32
K = 3
PH = H + 2            # 16
PW = W + 2            # 16
P = PH * PW           # 256  (lane axis, multiple of 128)


def conv3x3_kernel(x_ref, w_ref, o_ref):
    # x_ref: (CIN, 256)      spatially padded input, NCHW-flat (spatial on lanes)
    # w_ref: (9, COUT, CIN)  per-tap weight slabs (lane-dense CIN)
    # o_ref: (COUT, 256)     conv output on the padded spatial frame
    x = x_ref[...]
    acc = None
    for dy in range(K):
        for dx in range(K):
            t = dy * K + dx
            off = (dy - 1) * PW + (dx - 1)          # linear shift on the padded frame
            # xs[c, p] = x[c, p + off]; circular wrap only contaminates the
            # padded border positions, which the wrapper discards.
            xs = x if off == 0 else pltpu.roll(x, shift=(-off) % P, axis=1)
            part = jax.lax.dot_general(
                w_ref[t], xs,
                dimension_numbers=(((1,), (0,)), ((), ())),
                preferred_element_type=jnp.float32,
            )
            acc = part if acc is None else acc + part
    o_ref[...] = acc


def conv2d_3x3_same(x_nchw, w_oihw):
    """Conv2d(128->32, k=3, s=1, p=1, bias=False), NCHW in / NCHW out."""
    # NCHW-native: spatial zero-pad (cheap contiguous copy, no relayout) + flatten.
    x_pad = jnp.pad(x_nchw[0], ((0, 0), (1, 1), (1, 1)))              # (CIN, 16, 16)
    x_flat = x_pad.reshape(CIN, P)                                    # (CIN, 256)
    # Lane-dense per-tap weight slabs: OIHW (32,128,3,3) -> (9, 32, 128).
    w_packed = jnp.transpose(w_oihw, (2, 3, 0, 1)).reshape(K * K, COUT, CIN)

    out_flat = pl.pallas_call(
        conv3x3_kernel,
        out_shape=jax.ShapeDtypeStruct((COUT, P), jnp.float32),
        in_specs=[
            pl.BlockSpec(memory_space=pltpu.MemorySpace.VMEM),
            pl.BlockSpec(memory_space=pltpu.MemorySpace.VMEM),
        ],
        out_specs=pl.BlockSpec(memory_space=pltpu.MemorySpace.VMEM),
    )(x_flat, w_packed)

    # Drop the padded border; result is already contiguous NCHW for the concat.
    out = out_flat.reshape(COUT, PH, PW)[:, 1:1 + H, 1:1 + W]         # (32, 14, 14)
    return out[None]                                                  # (1, 32, 14, 14)


def forward(x384, x140, xs_32_list, x392, conv_w):
    """Mirror of M.forward. xs_32_list holds x147..x378 (34 tensors of 32 ch)."""
    x385 = conv2d_3x3_same(x384, conv_w)
    # torch.cat([x140, x147..x378, x385, x392], dim=1) -- pure data movement,
    # left to XLA's concatenate (the module's HBM-bandwidth roofline).
    return jnp.concatenate([x140] + list(xs_32_list) + [x385, x392], axis=1)


if __name__ == "__main__":
    key = jax.random.PRNGKey(0)
    keys = jax.random.split(key, 40)

    # Deterministic "weights" and inputs (shapes fixed by the module).
    conv_w = jax.random.normal(keys[0], (COUT, CIN, K, K), jnp.float32) * 0.05

    x384 = jax.random.normal(keys[1], (1, 128, 14, 14), jnp.float32)   # conv input
    x140 = jax.random.normal(keys[2], (1, 256, 14, 14), jnp.float32)
    xs_32 = [jax.random.normal(keys[3 + i], (1, 32, 14, 14), jnp.float32)
             for i in range(34)]                                       # x147 .. x378
    x392 = jax.random.normal(keys[37], (1, 32, 14, 14), jnp.float32)

    fwd = jax.jit(forward)
    out = fwd(x384, x140, xs_32, x392, conv_w)
    out = jax.block_until_ready(out)

    # Shape check: 256 + 34*32 + 32 (conv) + 32 = 1408 channels.
    assert out.shape == (1, 1408, 14, 14), out.shape

    # Numerical check of the Pallas conv against XLA's reference conv.
    ref_conv = jax.lax.conv_general_dilated(
        x384, conv_w, window_strides=(1, 1), padding=((1, 1), (1, 1)),
        dimension_numbers=("NCHW", "OIHW", "NCHW"))
    pallas_conv = out[:, 256 + 34 * 32: 256 + 34 * 32 + 32]
    assert jnp.allclose(pallas_conv, ref_conv, atol=1e-3, rtol=1e-3)

    print("KERNEL_OK")
</pallas_src>

<mosaic_0001>
module attributes {stable_mosaic.version = 11 : i64} {
  func.func @conv3x3_kernel(%arg0: memref<128x256xf32, #tpu.memory_space<vmem>>, %arg1: memref<9x32x128xf32, #tpu.memory_space<vmem>>, %arg2: memref<32x256xf32, #tpu.memory_space<vmem>>) attributes {dimension_semantics = [], scalar_prefetch = 0 : i64, scratch_operands = 0 : i64, tpu.core_type = #tpu.core_type<tc>} {
    %c0 = arith.constant 0 : index
    %c0_0 = arith.constant 0 : index
    %0 = vector.load %arg0[%c0, %c0_0] : memref<128x256xf32, #tpu.memory_space<vmem>>, vector<128x256xf32>
    %c17_i32 = arith.constant 17 : i32
    %1 = tpu.dynamic_rotate %0 by %c17_i32 dim 1 : vector<128x256xf32>, i32 -> vector<128x256xf32>
    %c0_1 = arith.constant 0 : index
    %c0_2 = arith.constant 0 : index
    %c0_3 = arith.constant 0 : index
    %2 = vector.load %arg1[%c0_1, %c0_2, %c0_3] : memref<9x32x128xf32, #tpu.memory_space<vmem>>, vector<1x32x128xf32>
    %3 = vector.shape_cast %2 : vector<1x32x128xf32> to vector<32x128xf32>
    %cst = arith.constant dense<0.000000e+00> : vector<32x256xf32>
    %4 = tpu.matmul %3, %1, %cst {dimension_numbers = #tpu.dot_dimension_numbers<[1], [0], [0], [1], [0, 0, 1, 1], [], []>} : vector<32x128xf32>, vector<128x256xf32>, vector<32x256xf32> -> vector<32x256xf32>
    %c16_i32 = arith.constant 16 : i32
    %5 = tpu.dynamic_rotate %0 by %c16_i32 dim 1 : vector<128x256xf32>, i32 -> vector<128x256xf32>
    %c1 = arith.constant 1 : index
    %c0_4 = arith.constant 0 : index
    %c0_5 = arith.constant 0 : index
    %6 = vector.load %arg1[%c1, %c0_4, %c0_5] : memref<9x32x128xf32, #tpu.memory_space<vmem>>, vector<1x32x128xf32>
    %7 = vector.shape_cast %6 : vector<1x32x128xf32> to vector<32x128xf32>
    %cst_6 = arith.constant dense<0.000000e+00> : vector<32x256xf32>
    %8 = tpu.matmul %7, %5, %cst_6 {dimension_numbers = #tpu.dot_dimension_numbers<[1], [0], [0], [1], [0, 0, 1, 1], [], []>} : vector<32x128xf32>, vector<128x256xf32>, vector<32x256xf32> -> vector<32x256xf32>
    %9 = arith.addf %4, %8 : vector<32x256xf32>
    %c15_i32 = arith.constant 15 : i32
    %10 = tpu.dynamic_rotate %0 by %c15_i32 dim 1 : vector<128x256xf32>, i32 -> vector<128x256xf32>
    %c2 = arith.constant 2 : index
    %c0_7 = arith.constant 0 : index
    %c0_8 = arith.constant 0 : index
    %11 = vector.load %arg1[%c2, %c0_7, %c0_8] : memref<9x32x128xf32, #tpu.memory_space<vmem>>, vector<1x32x128xf32>
    %12 = vector.shape_cast %11 : vector<1x32x128xf32> to vector<32x128xf32>
    %cst_9 = arith.constant dense<0.000000e+00> : vector<32x256xf32>
    %13 = tpu.matmul %12, %10, %cst_9 {dimension_numbers = #tpu.dot_dimension_numbers<[1], [0], [0], [1], [0, 0, 1, 1], [], []>} : vector<32x128xf32>, vector<128x256xf32>, vector<32x256xf32> -> vector<32x256xf32>
    %14 = arith.addf %9, %13 : vector<32x256xf32>
    %c1_i32 = arith.constant 1 : i32
    %15 = tpu.dynamic_rotate %0 by %c1_i32 dim 1 : vector<128x256xf32>, i32 -> vector<128x256xf32>
    %c3 = arith.constant 3 : index
    %c0_10 = arith.constant 0 : index
    %c0_11 = arith.constant 0 : index
    %16 = vector.load %arg1[%c3, %c0_10, %c0_11] : memref<9x32x128xf32, #tpu.memory_space<vmem>>, vector<1x32x128xf32>
    %17 = vector.shape_cast %16 : vector<1x32x128xf32> to vector<32x128xf32>
    %cst_12 = arith.constant dense<0.000000e+00> : vector<32x256xf32>
    %18 = tpu.matmul %17, %15, %cst_12 {dimension_numbers = #tpu.dot_dimension_numbers<[1], [0], [0], [1], [0, 0, 1, 1], [], []>} : vector<32x128xf32>, vector<128x256xf32>, vector<32x256xf32> -> vector<32x256xf32>
    %19 = arith.addf %14, %18 : vector<32x256xf32>
    %c4 = arith.constant 4 : index
    %c0_13 = arith.constant 0 : index
    %c0_14 = arith.constant 0 : index
    %20 = vector.load %arg1[%c4, %c0_13, %c0_14] : memref<9x32x128xf32, #tpu.memory_space<vmem>>, vector<1x32x128xf32>
    %21 = vector.shape_cast %20 : vector<1x32x128xf32> to vector<32x128xf32>
    %cst_15 = arith.constant dense<0.000000e+00> : vector<32x256xf32>
    %22 = tpu.matmul %21, %0, %cst_15 {dimension_numbers = #tpu.dot_dimension_numbers<[1], [0], [0], [1], [0, 0, 1, 1], [], []>} : vector<32x128xf32>, vector<128x256xf32>, vector<32x256xf32> -> vector<32x256xf32>
    %23 = arith.addf %19, %22 : vector<32x256xf32>
    %c255_i32 = arith.constant 255 : i32
    %24 = tpu.dynamic_rotate %0 by %c255_i32 dim 1 : vector<128x256xf32>, i32 -> vector<128x256xf32>
    %c5 = arith.constant 5 : index
    %c0_16 = arith.constant 0 : index
    %c0_17 = arith.constant 0 : index
    %25 = vector.load %arg1[%c5, %c0_16, %c0_17] : memref<9x32x128xf32, #tpu.memory_space<vmem>>, vector<1x32x128xf32>
    %26 = vector.shape_cast %25 : vector<1x32x128xf32> to vector<32x128xf32>
    %cst_18 = arith.constant dense<0.000000e+00> : vector<32x256xf32>
    %27 = tpu.matmul %26, %24, %cst_18 {dimension_numbers = #tpu.dot_dimension_numbers<[1], [0], [0], [1], [0, 0, 1, 1], [], []>} : vector<32x128xf32>, vector<128x256xf32>, vector<32x256xf32> -> vector<32x256xf32>
    %28 = arith.addf %23, %27 : vector<32x256xf32>
    %c241_i32 = arith.constant 241 : i32
    %29 = tpu.dynamic_rotate %0 by %c241_i32 dim 1 : vector<128x256xf32>, i32 -> vector<128x256xf32>
    %c6 = arith.constant 6 : index
    %c0_19 = arith.constant 0 : index
    %c0_20 = arith.constant 0 : index
    %30 = vector.load %arg1[%c6, %c0_19, %c0_20] : memref<9x32x128xf32, #tpu.memory_space<vmem>>, vector<1x32x128xf32>
    %31 = vector.shape_cast %30 : vector<1x32x128xf32> to vector<32x128xf32>
    %cst_21 = arith.constant dense<0.000000e+00> : vector<32x256xf32>
    %32 = tpu.matmul %31, %29, %cst_21 {dimension_numbers = #tpu.dot_dimension_numbers<[1], [0], [0], [1], [0, 0, 1, 1], [], []>} : vector<32x128xf32>, vector<128x256xf32>, vector<32x256xf32> -> vector<32x256xf32>
    %33 = arith.addf %28, %32 : vector<32x256xf32>
    %c240_i32 = arith.constant 240 : i32
    %34 = tpu.dynamic_rotate %0 by %c240_i32 dim 1 : vector<128x256xf32>, i32 -> vector<128x256xf32>
    %c7 = arith.constant 7 : index
    %c0_22 = arith.constant 0 : index
    %c0_23 = arith.constant 0 : index
    %35 = vector.load %arg1[%c7, %c0_22, %c0_23] : memref<9x32x128xf32, #tpu.memory_space<vmem>>, vector<1x32x128xf32>
    %36 = vector.shape_cast %35 : vector<1x32x128xf32> to vector<32x128xf32>
    %cst_24 = arith.constant dense<0.000000e+00> : vector<32x256xf32>
    %37 = tpu.matmul %36, %34, %cst_24 {dimension_numbers = #tpu.dot_dimension_numbers<[1], [0], [0], [1], [0, 0, 1, 1], [], []>} : vector<32x128xf32>, vector<128x256xf32>, vector<32x256xf32> -> vector<32x256xf32>
    %38 = arith.addf %33, %37 : vector<32x256xf32>
    %c239_i32 = arith.constant 239 : i32
    %39 = tpu.dynamic_rotate %0 by %c239_i32 dim 1 : vector<128x256xf32>, i32 -> vector<128x256xf32>
    %c8 = arith.constant 8 : index
    %c0_25 = arith.constant 0 : index
    %c0_26 = arith.constant 0 : index
    %40 = vector.load %arg1[%c8, %c0_25, %c0_26] : memref<9x32x128xf32, #tpu.memory_space<vmem>>, vector<1x32x128xf32>
    %41 = vector.shape_cast %40 : vector<1x32x128xf32> to vector<32x128xf32>
    %cst_27 = arith.constant dense<0.000000e+00> : vector<32x256xf32>
    %42 = tpu.matmul %41, %39, %cst_27 {dimension_numbers = #tpu.dot_dimension_numbers<[1], [0], [0], [1], [0, 0, 1, 1], [], []>} : vector<32x128xf32>, vector<128x256xf32>, vector<32x256xf32> -> vector<32x256xf32>
    %43 = arith.addf %38, %42 : vector<32x256xf32>
    %c0_28 = arith.constant 0 : index
    %c0_29 = arith.constant 0 : index
    %44 = vector.load %arg2[%c0_28, %c0_29] : memref<32x256xf32, #tpu.memory_space<vmem>>, vector<32x256xf32>
    tpu.vector_store %arg2[%c0_28, %c0_29], %43 {strides = array<i32>} : memref<32x256xf32, #tpu.memory_space<vmem>>, vector<32x256xf32>,
    return
  }
}

</mosaic_0001>

<bundles_post_ra>
// kernel: forward.1
= control target key start
LH: loop header
LB: loop body
LE: loop exit
PB: predicated region body
PF: predicated region fallthrough
CT: control target
= control target key end

     0   :  { %7 = vsyncpa [#allocation3], 0  ;;  %s2825_s9 = smov [#allocation2]   ;;  %s4166_s0 = inlined_call_operand.vmem [shape: f32[128,256], index: 0, kind: input, shape index: {}]   ;;  %s4167_s1 = inlined_call_operand.hbm [shape: f32[9,32,128], index: 1, kind: input, shape index: {}]   ;;  %s4168_s2 = inlined_call_operand.vmem [shape: f32[32,256], index: 2, kind: output, shape index: {}]  }
   0x1   :  { %s15_s10 = sshll.u32 %s2825_s9, 4  ;;  %s2801_s13 = scalar_lea.hbm %s4167_s1, 4608  ;;  %s16_s10 = int_to_ptr.vmem [resolvable:$true] %s15_s10 }
   0x2   :  { %p2802_p0 = scmp.ne.s32.totalorder %s4167_s1, %s2801_s13  ;;  %p2805_p1 = scmp.lt.u32.totalorder %s2801_s13, %s4167_s1 }
   0x4   :  { %p2807_p2 = pnand %p2805_p1, %p2802_p0 }
   0x6   :  { %2810 = shalt.err (!%p2807_p2)
}
   0x7   :  { %s2811_s18 = scalar_lea.vmem %s16_s10, 4608  ;;  %p2816_p4 = scmp.lt.s32.totalorder %s16_s10, %s16_s10 }
   0x8   :  { %p2812_p3 = scmp.ne.s32.totalorder %s16_s10, %s2811_s18  ;;  %p2817_p5 = scmp.lt.s32.totalorder %s2811_s18, %s2811_s18 }
   0xa   :  { %p2818_p6 = por %p2817_p5, %p2816_p4 }
   0xc   :  { %p2819_p7 = pnand %p2818_p6, %p2812_p3 }
   0xe   :  { %2822 = shalt.err (!%p2819_p7)
}
   0xf   :  { %s2826_s19 = smov 128   ;;  %s2827_s20 = smov 8  }
  0x10   :  { %21 = dma.hbm_to_vmem [thread:$0]  %s4167_s1, 4608, %s16_s10, [#allocation3], %s2826_s19, %s2826_s19, %s2827_s20  }
  0x11   :  { %2823 = dma.done.wait [#allocation3], 4608  }
  0x12   :  { %2824 = vsyncadd [#allocation3], 4294962688  ;;  %v2867_v0 = vld [vmem:[%s4166_s0 + $0x40] sm:$0xff]  ;;  %v2872_v1 = vld [vmem:[%s4166_s0 + $0x50] sm:$0xff]  ;;  %s2828_s10 = smov 17   ;;  %s2829_s30 = smov 16  }
  0x13   :  { %v2877_v2 = vld [vmem:[%s4166_s0] sm:$0xff]  ;;  %v2881_v3 = vpack.i.bf16 %v2872_v1, %v2867_v0  ;;  %v27_v4 = vld [vmem:[%s4166_s0 + $0x10] sm:$0xff]  ;;  %v30_v24 = vld [vmem:[%s4166_s0 + $0x28] sm:$0xff]  ;;  %v1887_v53 = vpack.c.bf16 %v2872_v1, %v2867_v0  ;;  %v2830_v0 = vmov 0.0   ;;  %s2832_s3 = smov 15   ;;  %s2833_s4 = smov 113  }
  0x14   :  { %v2889_v5 = vld [vmem:[%s4166_s0 + $0x60] sm:$0xff]  ;;  %v2894_v6 = vld [vmem:[%s4166_s0 + $0x70] sm:$0xff]  ;;  %v2897_v7 = vpack.i.bf16 %v27_v4, %v2877_v2  ;;  %v32_v25 = vld [vmem:[%s4166_s0 + $0x38] sm:$0xff]  ;;  %v1879_v48 = vpack.c.bf16 %v27_v4, %v2877_v2  ;;  %907 = vmatprep.mubr.f32.mxu0 %v2830_v0  ;;  %326 = vmatprep.mubr.f32.mxu1 %v2830_v0  ;;  %s2834_s5 = smov 1   ;;  %s2835_s6 = smov 112  }
  0x15   :  { %v2902_v8 = vld [vmem:[%s4166_s0 + $0x20] sm:$0xff]  ;;  %v2907_v9 = vld [vmem:[%s4166_s0 + $0x30] sm:$0xff]  ;;  %2140 = vrot.lane.b32.xlu1 %v2881_v3, %s2828_s10  ;;  %v2913_v10 = vpack.i.bf16 %v2894_v6, %v2889_v5  ;;  %v26_v26 = vld [vmem:[%s4166_s0 + $0x8] sm:$0xff]  ;;  %v2999_v28 = vpack.i.bf16 %v32_v25, %v30_v24  ;;  %v1881_v50 = vpack.c.bf16 %v32_v25, %v30_v24  ;;  %v1891_v55 = vpack.c.bf16 %v2894_v6, %v2889_v5  ;;  %s2836_s24 = smov 111  }
  0x16   :  { %2130 = vrot.lane.b32.xlu0 %v2897_v7, %s2828_s10  ;;  %v2919_v11 = vpack.i.bf16 %v2907_v9, %v2902_v8  ;;  %v2924_v12 = vld [vmem:[%s4166_s0 + $0xa0] sm:$0xff]  ;;  %v2929_v13 = vld [vmem:[%s4166_s0 + $0xb0] sm:$0xff]  ;;  %v28_v27 = vld [vmem:[%s4166_s0 + $0x18] sm:$0xff]  ;;  %v1883_v51 = vpack.c.bf16 %v2907_v9, %v2902_v8  ;;  %v121_v25 = vlaneseq }
  0x17   :  { %v2934_v14 = vld [vmem:[%s4166_s0 + $0x80] sm:$0xff]  ;;  %v2939_v15 = vld [vmem:[%s4166_s0 + $0x90] sm:$0xff]  ;;  %v2945_v16 = vpack.i.bf16 %v2929_v13, %v2924_v12  ;;  %v3003_v29 = vpack.i.bf16 %v28_v27, %v26_v26  ;;  %v38_v30 = vld [vmem:[%s4166_s0 + $0x68] sm:$0xff]  ;;  %v1877_v46 = vpack.c.bf16 %v28_v27, %v26_v26  ;;  %v1899_v59 = vpack.c.bf16 %v2929_v13, %v2924_v12 }
  0x18   :  { %v2951_v17 = vpack.i.bf16 %v2939_v15, %v2934_v14  ;;  %v2956_v18 = vld [vmem:[%s4166_s0 + $0xe0] sm:$0xff]  ;;  %v2961_v19 = vld [vmem:[%s4166_s0 + $0xf0] sm:$0xff]  ;;  %v40_v31 = vld [vmem:[%s4166_s0 + $0x78] sm:$0xff]  ;;  %v1895_v57 = vpack.c.bf16 %v2939_v15, %v2934_v14 }
  0x19   :  { %2145 = vrot.lane.b32.xlu1 %v2913_v10, %s2828_s10  ;;  %v2966_v20 = vld [vmem:[%s4166_s0 + $0xc0] sm:$0xff]  ;;  %v2971_v21 = vld [vmem:[%s4166_s0 + $0xd0] sm:$0xff]  ;;  %v2977_v22 = vpack.i.bf16 %v2961_v19, %v2956_v18  ;;  %v34_v32 = vld [vmem:[%s4166_s0 + $0x48] sm:$0xff]  ;;  %v3019_v34 = vpack.i.bf16 %v40_v31, %v38_v30  ;;  %1878 = vmatprep.subr.bf16.mxu0 %v1877_v46  ;;  %v1889_v54 = vpack.c.bf16 %v40_v31, %v38_v30  ;;  %v3214_v30 = vand.u32 127, %v121_v25 }
  0x1a   :  { %2135 = vrot.lane.b32.xlu0 %v2919_v11, %s2828_s10  ;;  %v2983_v23 = vpack.i.bf16 %v2971_v21, %v2966_v20  ;;  %v36_v33 = vld [vmem:[%s4166_s0 + $0x58] sm:$0xff]  ;;  %v46_v36 = vld [vmem:[%s4166_s0 + $0xa8] sm:$0xff]  ;;  %1880 = vmatpush1.bf16.msra.mxu0 %v1879_v48  ;;  %v1903_v61 = vpack.c.bf16 %v2971_v21, %v2966_v20  ;;  %v1907_v63 = vpack.c.bf16 %v2961_v19, %v2956_v18  ;;  %v839_v1 = vld [vmem:[#allocation2 + $0x80] sm:$0xff] }
  0x1b   :  { %v3023_v35 = vpack.i.bf16 %v36_v33, %v34_v32  ;;  %v48_v37 = vld [vmem:[%s4166_s0 + $0xb8] sm:$0xff]  ;;  %v42_v38 = vld [vmem:[%s4166_s0 + $0x88] sm:$0xff]  ;;  %1882 = vmatprep.subr.bf16.mxu0 %v1881_v50  ;;  %v1885_v52 = vpack.c.bf16 %v36_v33, %v34_v32  ;;  %v841_v4 = vld [vmem:[#allocation2 + $0x90] sm:$0xff]  ;;  %vm224_vm0 = vcmp.lt.s32.totalorder %v3214_v30, 16  ;;  %vm123_vm1 = vcmp.lt.s32.totalorder %v3214_v30, 17 }
  0x1c   :  { %v44_v39 = vld [vmem:[%s4166_s0 + $0x98] sm:$0xff]  ;;  %v3039_v40 = vpack.i.bf16 %v48_v37, %v46_v36  ;;  %v54_v42 = vld [vmem:[%s4166_s0 + $0xe8] sm:$0xff]  ;;  %v1897_v58 = vpack.c.bf16 %v48_v37, %v46_v36  ;;  %vm1004_vm2 = vcmp.lt.s32.totalorder %v3214_v30, 127  ;;  %vm504_vm3 = vcmp.lt.s32.totalorder %v3214_v30, 15 }
  0x1d   :  { %2155 = vrot.lane.b32.xlu1 %v2945_v16, %s2828_s10  ;;  %v3043_v41 = vpack.i.bf16 %v44_v39, %v42_v38  ;;  %v56_v43 = vld [vmem:[%s4166_s0 + $0xf8] sm:$0xff]  ;;  %v50_v44 = vld [vmem:[%s4166_s0 + $0xc8] sm:$0xff]  ;;  %v1893_v56 = vpack.c.bf16 %v44_v39, %v42_v38  ;;  %vm1203_vm4 = vcmp.lt.s32.totalorder %v3214_v30, 113  ;;  %vm703_vm5 = vcmp.lt.s32.totalorder %v3214_v30, 1 }
  0x1e   :  { %2150 = vrot.lane.b32.xlu0 %v2951_v17, %s2828_s10  ;;  %v52_v45 = vld [vmem:[%s4166_s0 + $0xd8] sm:$0xff]  ;;  %v3059_v47 = vpack.i.bf16 %v56_v43, %v54_v42  ;;  %1884 = vmatpush1.bf16.msra.mxu0 %v1883_v51  ;;  %v1905_v62 = vpack.c.bf16 %v56_v43, %v54_v42  ;;  %v840_v2 = vld [vmem:[#allocation2 + $0x88] sm:$0xff]  ;;  %vm1402_vm6 = vcmp.lt.s32.totalorder %v3214_v30, 112  ;;  %vm1601_vm7 = vcmp.lt.s32.totalorder %v3214_v30, 111 }
  0x1f   :  { %v3064_v49 = vpack.i.bf16 %v52_v45, %v50_v44  ;;  %1886 = vmatprep.subr.bf16.mxu0 %v1885_v52  ;;  %v1901_v60 = vpack.c.bf16 %v52_v45, %v50_v44  ;;  %v842_v5 = vld [vmem:[#allocation2 + $0x98] sm:$0xff] }
  0x21   :  { %2165 = vrot.lane.b32.xlu1 %v2977_v22, %s2828_s10 }
  0x22   :  { %2160 = vrot.lane.b32.xlu0 %v2983_v23, %s2828_s10  ;;  %1888 = vmatpush1.bf16.msra.mxu0 %v1887_v53 }
  0x23   :  { %1890 = vmatprep.subr.bf16.mxu0 %v1889_v54 }
  0x25   :  { %2175 = vrot.lane.b32.xlu1 %v2999_v28, %s2828_s10 }
  0x26   :  { %2170 = vrot.lane.b32.xlu0 %v3003_v29, %s2828_s10  ;;  %1892 = vmatpush1.bf16.msra.mxu0 %v1891_v55 }
  0x27   :  { %1894 = vmatprep.subr.bf16.mxu0 %v1893_v56 }
  0x29   :  { %2185 = vrot.lane.b32.xlu1 %v3019_v34, %s2828_s10 }
  0x2a   :  { %2180 = vrot.lane.b32.xlu0 %v3023_v35, %s2828_s10  ;;  %1896 = vmatpush1.bf16.msra.mxu0 %v1895_v57 }
  0x2b   :  { %1898 = vmatprep.subr.bf16.mxu0 %v1897_v58 }
  0x2d   :  { %2195 = vrot.lane.b32.xlu1 %v3039_v40, %s2828_s10 }
  0x2e   :  { %2190 = vrot.lane.b32.xlu0 %v3043_v41, %s2828_s10  ;;  %1900 = vmatpush1.bf16.msra.mxu0 %v1899_v59 }
  0x2f   :  { %1902 = vmatprep.subr.bf16.mxu0 %v1901_v60 }
  0x31   :  { %2205 = vrot.lane.b32.xlu1 %v3059_v47, %s2828_s10 }
  0x32   :  { %2200 = vrot.lane.b32.xlu0 %v3064_v49, %s2828_s10  ;;  %1904 = vmatpush1.bf16.msra.mxu0 %v1903_v61  ;;  %s2831_s10 = smov 127  }
  0x33   :  { %1906 = vmatprep.subr.bf16.mxu0 %v1905_v62 }
  0x35   :  { %2215 = vrot.lane.b32.xlu1 %v2919_v11, %s2829_s30 }
  0x36   :  { %2210 = vrot.lane.b32.xlu0 %v2897_v7, %s2829_s30  ;;  %1908 = vmatpush1.bf16.msra.mxu0 %v1907_v63 }
  0x39   :  { %2225 = vrot.lane.b32.xlu1 %v2999_v28, %s2829_s30  ;;  %908 = vmatmul.mubr.f32.vlgmr.msra.gmra.mrb[0].mxu0 %v839_v1 }
  0x3a   :  { %2220 = vrot.lane.b32.xlu0 %v3003_v29, %s2829_s30  ;;  %913 = vmatprep.mubr.f32.mxu0 %v2830_v0 }
  0x3d   :  { %2235 = vrot.lane.b32.xlu1 %v3023_v35, %s2829_s30  ;;  %914 = vmatmul.mubr.f32.gmra.mrb[2].mxu0 %v840_v2 }
  0x3e   :  { %2230 = vrot.lane.b32.xlu0 %v2881_v3, %s2829_s30  ;;  %919 = vmatprep.mubr.f32.mxu0 %v2830_v0 }
  0x41   :  { %2245 = vrot.lane.b32.xlu1 %v3019_v34, %s2829_s30  ;;  %920 = vmatmul.mubr.f32.gmra.mrb[4].mxu0 %v841_v4 }
  0x42   :  { %2240 = vrot.lane.b32.xlu0 %v2913_v10, %s2829_s30  ;;  %925 = vmatprep.mubr.f32.mxu0 %v2830_v0 }
  0x45   :  { %2255 = vrot.lane.b32.xlu1 %v3043_v41, %s2829_s30  ;;  %926 = vmatmul.mubr.f32.gmra.mrb[6].mxu0 %v842_v5 }
  0x46   :  { %2250 = vrot.lane.b32.xlu0 %v2951_v17, %s2829_s30  ;;  %1106 = vmatprep.mubr.f32.mxu0 %v2830_v0 }
  0x49   :  { %2265 = vrot.lane.b32.xlu1 %v3039_v40, %s2829_s30 }
  0x4a   :  { %2260 = vrot.lane.b32.xlu0 %v2945_v16, %s2829_s30 }
  0x4d   :  { %2275 = vrot.lane.b32.xlu1 %v3064_v49, %s2829_s30 }
  0x4e   :  { %2270 = vrot.lane.b32.xlu0 %v2983_v23, %s2829_s30 }
  0x51   :  { %2285 = vrot.lane.b32.xlu1 %v3059_v47, %s2829_s30 }
  0x52   :  { %2280 = vrot.lane.b32.xlu0 %v2977_v22, %s2829_s30 }
  0x55   :  { %2295 = vrot.lane.b32.xlu1 %v3003_v29, %s2831_s10 }
  0x56   :  { %2290 = vrot.lane.b32.xlu0 %v2897_v7, %s2831_s10 }
  0x59   :  { %2305 = vrot.lane.b32.xlu1 %v2999_v28, %s2831_s10 }
  0x5a   :  { %2300 = vrot.lane.b32.xlu0 %v2919_v11, %s2831_s10 }
  0x5d   :  { %2315 = vrot.lane.b32.xlu1 %v3023_v35, %s2831_s10 }
  0x5e   :  { %2310 = vrot.lane.b32.xlu0 %v2881_v3, %s2831_s10 }
  0x61   :  { %2325 = vrot.lane.b32.xlu1 %v3019_v34, %s2831_s10 }
  0x62   :  { %2320 = vrot.lane.b32.xlu0 %v2913_v10, %s2831_s10 }
  0x65   :  { %2335 = vrot.lane.b32.xlu1 %v3043_v41, %s2831_s10 }
  0x66   :  { %2330 = vrot.lane.b32.xlu0 %v2951_v17, %s2831_s10 }
  0x69   :  { %2345 = vrot.lane.b32.xlu1 %v3039_v40, %s2831_s10 }
  0x6a   :  { %2340 = vrot.lane.b32.xlu0 %v2945_v16, %s2831_s10 }
  0x6d   :  { %2355 = vrot.lane.b32.xlu1 %v3064_v49, %s2831_s10 }
  0x6e   :  { %2350 = vrot.lane.b32.xlu0 %v2983_v23, %s2831_s10 }
  0x71   :  { %2365 = vrot.lane.b32.xlu1 %v3059_v47, %s2831_s10 }
  0x72   :  { %2360 = vrot.lane.b32.xlu0 %v2977_v22, %s2831_s10 }
  0x75   :  { %2375 = vrot.lane.b32.xlu1 %v3003_v29, %s2832_s3 }
  0x76   :  { %2370 = vrot.lane.b32.xlu0 %v2897_v7, %s2832_s3 }
  0x79   :  { %2385 = vrot.lane.b32.xlu1 %v3003_v29, %s2833_s4 }
  0x7a   :  { %2380 = vrot.lane.b32.xlu0 %v2897_v7, %s2833_s4 }
  0x7d   :  { %2395 = vrot.lane.b32.xlu1 %v2999_v28, %s2832_s3 }
  0x7e   :  { %2390 = vrot.lane.b32.xlu0 %v2919_v11, %s2832_s3 }
  0x81   :  { %2405 = vrot.lane.b32.xlu1 %v2999_v28, %s2833_s4 }
  0x82   :  { %2400 = vrot.lane.b32.xlu0 %v2919_v11, %s2833_s4 }
  0x85   :  { %2415 = vrot.lane.b32.xlu1 %v3023_v35, %s2832_s3 }
  0x86   :  { %2410 = vrot.lane.b32.xlu0 %v2881_v3, %s2832_s3 }
  0x87   :  { %v3158_v6 = vpop.permute.xlu1 %2140 }
  0x88   :  { %v3160_v8 = vpop.permute.xlu0 %2130 }
  0x89   :  { %2425 = vrot.lane.b32.xlu1 %v3023_v35, %s2833_s4 }
  0x8a   :  { %2420 = vrot.lane.b32.xlu0 %v2881_v3, %s2833_s4 }
  0x8b   :  { %v3166_v9 = vpop.permute.xlu1 %2145 }
  0x8c   :  { %v3168_v12 = vpop.permute.xlu0 %2135 }
  0x8d   :  { %2435 = vrot.lane.b32.xlu1 %v3019_v34, %s2832_s3 }
  0x8e   :  { %2430 = vrot.lane.b32.xlu0 %v2913_v10, %s2832_s3 }
  0x8f   :  { %v3174_v13 = vpop.permute.xlu1 %2155 }
  0x90   :  { %v3176_v14 = vpop.permute.xlu0 %2150 }
  0x91   :  { %2445 = vrot.lane.b32.xlu1 %v3019_v34, %s2833_s4 }
  0x92   :  { %2440 = vrot.lane.b32.xlu0 %v2913_v10, %s2833_s4 }
  0x93   :  { %v3182_v15 = vpop.permute.xlu1 %2165 }
  0x94   :  { %v3184_v18 = vpop.permute.xlu0 %2160 }
  0x95   :  { %2455 = vrot.lane.b32.xlu1 %v3043_v41, %s2832_s3 }
  0x96   :  { %2450 = vrot.lane.b32.xlu0 %v2951_v17, %s2832_s3 }
  0x97   :  { %v3190_v19 = vpop.permute.xlu1 %2175 }
  0x98   :  { %v3192_v20 = vpop.permute.xlu0 %2170 }
  0x99   :  { %2465 = vrot.lane.b32.xlu1 %v3043_v41, %s2833_s4 }
  0x9a   :  { %2460 = vrot.lane.b32.xlu0 %v2951_v17, %s2833_s4 }
  0x9b   :  { %v3198_v21 = vpop.permute.xlu1 %2185 }
  0x9c   :  { %v3200_v24 = vpop.permute.xlu0 %2180 }
  0x9d   :  { %2475 = vrot.lane.b32.xlu1 %v3039_v40, %s2832_s3 }
  0x9e   :  { %2470 = vrot.lane.b32.xlu0 %v2945_v16, %s2832_s3 }
  0x9f   :  { %v3206_v26 = vpop.permute.xlu1 %2195 }
  0xa0   :  { %v3208_v27 = vpop.permute.xlu0 %2190 }
  0xa1   :  { %2485 = vrot.lane.b32.xlu1 %v3039_v40, %s2833_s4 }
  0xa2   :  { %2480 = vrot.lane.b32.xlu0 %v2945_v16, %s2833_s4 }
  0xa3   :  { %v3216_v31 = vpop.permute.xlu1 %2205 }
  0xa4   :  { %v3218_v32 = vpop.permute.xlu0 %2200 }
  0xa5   :  { %2495 = vrot.lane.b32.xlu1 %v3064_v49, %s2832_s3 }
  0xa6   :  { %2490 = vrot.lane.b32.xlu0 %v2983_v23, %s2832_s3 }
  0xa7   :  { %v2216_v33 = vpop.permute.xlu1 %2215 }
  0xa8   :  { %v2211_v36 = vpop.permute.xlu0 %2210  ;;  %v2218_v38 = vunpack.i.h.bf16 %v2216_v33  ;;  %v2217_v39 = vunpack.i.l.bf16 %v2216_v33 }
  0xa9   :  { %2505 = vrot.lane.b32.xlu1 %v3064_v49, %s2833_s4  ;;  %v2213_v45 = vunpack.i.h.bf16 %v2211_v36  ;;  %v2212_v46 = vunpack.i.l.bf16 %v2211_v36 }
  0xaa   :  { %2500 = vrot.lane.b32.xlu0 %v2983_v23, %s2833_s4 }
  0xab   :  { %v2226_v37 = vpop.permute.xlu1 %2225 }
  0xac   :  { %v2228_v42 = vunpack.i.h.bf16 %v2226_v37  ;;  %v2227_v43 = vunpack.i.l.bf16 %v2226_v37  ;;  %v2221_v44 = vpop.permute.xlu0 %2220  ;;  %v2143_v37 = vunpack.i.h.bf16 %v3158_v6 }
  0xad   :  { %v2223_v48 = vunpack.i.h.bf16 %v2221_v44  ;;  %v2222_v50 = vunpack.i.l.bf16 %v2221_v44  ;;  %2515 = vrot.lane.b32.xlu1 %v3059_v47, %s2832_s3 }
  0xae   :  { %2510 = vrot.lane.b32.xlu0 %v2977_v22, %s2832_s3  ;;  %v227_v51 = vsel %vm224_vm0, %v2217_v39, %v2227_v43  ;;  %v228_v52 = vsel %vm224_vm0, %v2218_v38, %v2228_v42  ;;  %v243_v4 = vsel %vm224_vm0, %v2227_v43, %v2217_v39  ;;  %v244_v5 = vsel %vm224_vm0, %v2228_v42, %v2218_v38 }
  0xaf   :  { %v2236_v53 = vpop.permute.xlu1 %2235  ;;  %v225_v54 = vsel %vm224_vm0, %v2212_v46, %v2222_v50  ;;  %v226_v55 = vsel %vm224_vm0, %v2213_v45, %v2223_v48  ;;  %v241_v56 = vsel %vm224_vm0, %v2222_v50, %v2212_v46  ;;  %v242_v57 = vsel %vm224_vm0, %v2223_v48, %v2213_v45 }
  0xb0   :  { %v2238_v58 = vunpack.i.h.bf16 %v2236_v53  ;;  %v2237_v59 = vunpack.i.l.bf16 %v2236_v53  ;;  %v2231_v60 = vpop.permute.xlu0 %2230  ;;  %v1749_v61 = vpack.c.bf16 %v226_v55, %v225_v54  ;;  %v1751_v62 = vpack.c.bf16 %v242_v57, %v241_v56 }
  0xb1   :  { %v2233_v63 = vunpack.i.h.bf16 %v2231_v60  ;;  %v2232_v1 = vunpack.i.l.bf16 %v2231_v60  ;;  %2525 = vrot.lane.b32.xlu1 %v3059_v47, %s2833_s4  ;;  %v1753_v2 = vpack.c.bf16 %v228_v52, %v227_v51  ;;  %v2133_v39 = vunpack.i.h.bf16 %v3160_v8 }
  0xb2   :  { %2520 = vrot.lane.b32.xlu0 %v2977_v22, %s2833_s4  ;;  %1750 = vmatprep.subr.bf16.mxu1 %v1749_v61  ;;  %v2142_v22 = vunpack.i.l.bf16 %v3158_v6  ;;  %v1755_v42 = vpack.c.bf16 %v244_v5, %v243_v4  ;;  %v2132_v48 = vunpack.i.l.bf16 %v3160_v8  ;;  %v2148_v53 = vunpack.i.h.bf16 %v3166_v9 }
  0xb3   :  { %1752 = vmatpush1.bf16.msra.mxu1 %v1751_v62  ;;  %v2246_v25 = vpop.permute.xlu1 %2245  ;;  %v229_v33 = vsel %vm224_vm0, %v2232_v1, %v2237_v59  ;;  %v230_v36 = vsel %vm224_vm0, %v2233_v63, %v2238_v58  ;;  %v245_v51 = vsel %vm224_vm0, %v2237_v59, %v2232_v1  ;;  %v246_v52 = vsel %vm224_vm0, %v2238_v58, %v2233_v63 }
  0xb4   :  { %v2248_v44 = vunpack.i.h.bf16 %v2246_v25  ;;  %v2247_v45 = vunpack.i.l.bf16 %v2246_v25  ;;  %v2241_v46 = vpop.permute.xlu0 %2240  ;;  %1754 = vmatprep.subr.bf16.mxu1 %v1753_v2  ;;  %v1757_v50 = vpack.c.bf16 %v230_v36, %v229_v33  ;;  %v2147_v54 = vunpack.i.l.bf16 %v3166_v9 }
  0xb5   :  { %v2243_v43 = vunpack.i.h.bf16 %v2241_v46  ;;  %v2242_v38 = vunpack.i.l.bf16 %v2241_v46  ;;  %2535 = vrot.lane.b32.xlu1 %v3003_v29, %s2834_s5  ;;  %v2138_v60 = vunpack.i.h.bf16 %v3168_v12  ;;  %v2137_v61 = vunpack.i.l.bf16 %v3168_v12 }
  0xb6   :  { %2530 = vrot.lane.b32.xlu0 %v2897_v7, %s2834_s5  ;;  %v2177_v58 = vunpack.i.l.bf16 %v3190_v19  ;;  %v1759_v4 = vpack.c.bf16 %v246_v52, %v245_v51  ;;  %v2178_v5 = vunpack.i.h.bf16 %v3190_v19  ;;  %v2158_v36 = vunpack.i.h.bf16 %v3174_v13 }
  0xb7   :  { %1756 = vmatpush1.bf16.msra.mxu1 %v1755_v42  ;;  %v2256_v55 = vpop.permute.xlu1 %2255  ;;  %v231_v56 = vsel %vm224_vm0, %v2242_v38, %v2247_v45  ;;  %v232_v57 = vsel %vm224_vm0, %v2243_v43, %v2248_v44  ;;  %v247_v12 = vsel %vm224_vm0, %v2247_v45, %v2242_v38  ;;  %v248_v33 = vsel %vm224_vm0, %v2248_v44, %v2243_v43 }
  0xb8   :  { %v2258_v59 = vunpack.i.h.bf16 %v2256_v55  ;;  %v2257_v62 = vunpack.i.l.bf16 %v2256_v55  ;;  %v2251_v1 = vpop.permute.xlu0 %2250  ;;  %1758 = vmatprep.subr.bf16.mxu1 %v1757_v50  ;;  %v1761_v25 = vpack.c.bf16 %v232_v57, %v231_v56  ;;  %v2172_v46 = vunpack.i.l.bf16 %v3192_v20 }
  0xb9   :  { %v2253_v63 = vunpack.i.h.bf16 %v2251_v1  ;;  %v2252_v2 = vunpack.i.l.bf16 %v2251_v1  ;;  %2545 = vrot.lane.b32.xlu1 %v3003_v29, %s2835_s6  ;;  %v2173_v50 = vunpack.i.h.bf16 %v3192_v20  ;;  %v3298_v44 = vsel %vm123_vm1, %v2177_v58, %v2137_v61 }
  0xba   :  { %2540 = vrot.lane.b32.xlu0 %v2897_v7, %s2835_s6  ;;  %v2157_v7 = vunpack.i.l.bf16 %v3174_v13  ;;  %v1763_v55 = vpack.c.bf16 %v248_v33, %v247_v12  ;;  %v3304_v56 = vsel %vm123_vm1, %v2178_v5, %v2138_v60  ;;  %v2188_v8 = vunpack.i.h.bf16 %v3198_v21 }
  0xbb   :  { %1760 = vmatpush1.bf16.msra.mxu1 %v1759_v4  ;;  %v2266_v42 = vpop.permute.xlu1 %2265  ;;  %v233_v29 = vsel %vm224_vm0, %v2252_v2, %v2257_v62  ;;  %v234_v19 = vsel %vm224_vm0, %v2253_v63, %v2258_v59  ;;  %v249_v57 = vsel %vm224_vm0, %v2257_v62, %v2252_v2  ;;  %v250_v1 = vsel %vm224_vm0, %v2258_v59, %v2253_v63 }
  0xbc   :  { %v2268_v45 = vunpack.i.h.bf16 %v2266_v42  ;;  %v2267_v38 = vunpack.i.l.bf16 %v2266_v42  ;;  %v2261_v51 = vpop.permute.xlu0 %2260  ;;  %1762 = vmatprep.subr.bf16.mxu1 %v1761_v25  ;;  %v1765_v20 = vpack.c.bf16 %v234_v19, %v233_v29  ;;  %v3316_v4 = vsel %vm123_vm1, %v2172_v46, %v2132_v48 }
  0xbd   :  { %v2263_v43 = vunpack.i.h.bf16 %v2261_v51  ;;  %v2262_v52 = vunpack.i.l.bf16 %v2261_v51  ;;  %2555 = vrot.lane.b32.xlu1 %v2999_v28, %s2834_s5  ;;  %v3324_v62 = vsel %vm123_vm1, %v2137_v61, %v2177_v58  ;;  %v3330_v59 = vsel %vm123_vm1, %v2173_v50, %v2133_v39 }
  0xbe   :  { %2550 = vrot.lane.b32.xlu0 %v2919_v11, %s2834_s5  ;;  %v3337_v29 = vsel %vm123_vm1, %v2132_v48, %v2172_v46  ;;  %v1767_v19 = vpack.c.bf16 %v250_v1, %v249_v57  ;;  %v3345_v51 = vsel %vm123_vm1, %v2133_v39, %v2173_v50 }
  0xbf   :  { %1764 = vmatpush1.bf16.msra.mxu1 %v1763_v55  ;;  %v2276_v25 = vpop.permute.xlu1 %2275  ;;  %v235_v12 = vsel %vm224_vm0, %v2262_v52, %v2267_v38  ;;  %v236_v33 = vsel %vm224_vm0, %v2263_v43, %v2268_v45  ;;  %v251_v48 = vsel %vm224_vm0, %v2267_v38, %v2262_v52  ;;  %v252_v46 = vsel %vm224_vm0, %v2268_v45, %v2263_v43 }
  0xc0   :  { %v2278_v63 = vunpack.i.h.bf16 %v2276_v25  ;;  %v2277_v2 = vunpack.i.l.bf16 %v2276_v25  ;;  %v2271_v42 = vpop.permute.xlu0 %2270  ;;  %1766 = vmatprep.subr.bf16.mxu1 %v1765_v20  ;;  %v1769_v55 = vpack.c.bf16 %v236_v33, %v235_v12  ;;  %v2187_v20 = vunpack.i.l.bf16 %v3198_v21 }
  0xc1   :  { %v2273_v61 = vunpack.i.h.bf16 %v2271_v42  ;;  %v2272_v58 = vunpack.i.l.bf16 %v2271_v42  ;;  %2565 = vrot.lane.b32.xlu1 %v2999_v28, %s2835_s6  ;;  %v3355_v28 = vsel %vm123_vm1, %v2138_v60, %v2178_v5  ;;  %v1781_v60 = vpack.c.bf16 %v3345_v51, %v3337_v29 }
  0xc2   :  { %2560 = vrot.lane.b32.xlu0 %v2919_v11, %s2835_s6  ;;  %v1783_v5 = vpack.c.bf16 %v3330_v59, %v3316_v4  ;;  %v2183_v21 = vunpack.i.h.bf16 %v3200_v24  ;;  %v1771_v1 = vpack.c.bf16 %v252_v46, %v251_v48  ;;  %v2182_v25 = vunpack.i.l.bf16 %v3200_v24 }
  0xc3   :  { %1768 = vmatpush1.bf16.msra.mxu1 %v1767_v19  ;;  %v2286_v39 = vpop.permute.xlu1 %2285  ;;  %v237_v11 = vsel %vm224_vm0, %v2272_v58, %v2277_v2  ;;  %v238_v50 = vsel %vm224_vm0, %v2273_v61, %v2278_v63  ;;  %v253_v33 = vsel %vm224_vm0, %v2277_v2, %v2272_v58  ;;  %v254_v42 = vsel %vm224_vm0, %v2278_v63, %v2273_v61 }
  0xc4   :  { %v2288_v38 = vunpack.i.h.bf16 %v2286_v39  ;;  %v2287_v52 = vunpack.i.l.bf16 %v2286_v39  ;;  %v2281_v57 = vpop.permute.xlu0 %2280  ;;  %1770 = vmatprep.subr.bf16.mxu1 %v1769_v55  ;;  %v1773_v12 = vpack.c.bf16 %v238_v50, %v237_v11  ;;  %v1785_v24 = vpack.c.bf16 %v3355_v28, %v3324_v62 }
  0xc5   :  { %v2283_v45 = vunpack.i.h.bf16 %v2281_v57  ;;  %v2282_v43 = vunpack.i.l.bf16 %v2281_v57  ;;  %2575 = vrot.lane.b32.xlu1 %v3023_v35, %s2834_s5  ;;  %v3389_v2 = vsel %vm123_vm1, %v2188_v8, %v2148_v53  ;;  %v3395_v63 = vsel %vm123_vm1, %v2187_v20, %v2147_v54 }
  0xc6   :  { %2570 = vrot.lane.b32.xlu0 %v2881_v3, %s2834_s5  ;;  %v1775_v57 = vpack.c.bf16 %v254_v42, %v253_v33 }
  0xc7   :  { %1772 = vmatpush1.bf16.msra.mxu1 %v1771_v1  ;;  %v2296_v19 = vpop.permute.xlu1 %2295  ;;  %v239_v55 = vsel %vm224_vm0, %v2282_v43, %v2287_v52  ;;  %v240_v48 = vsel %vm224_vm0, %v2283_v45, %v2288_v38  ;;  %v3403_v1 = vsel %vm123_vm1, %v2147_v54, %v2187_v20 }
  0xc8   :  { %v2298_v61 = vunpack.i.h.bf16 %v2296_v19  ;;  %v2297_v58 = vunpack.i.l.bf16 %v2296_v19  ;;  %v2291_v39 = vpop.permute.xlu0 %2290  ;;  %1774 = vmatprep.subr.bf16.mxu1 %v1773_v12  ;;  %v1777_v46 = vpack.c.bf16 %v240_v48, %v239_v55  ;;  %v255_v19 = vsel %vm224_vm0, %v2287_v52, %v2282_v43 }
  0xc9   :  { %v2293_v11 = vunpack.i.h.bf16 %v2291_v39  ;;  %v2292_v50 = vunpack.i.l.bf16 %v2291_v39  ;;  %2585 = vrot.lane.b32.xlu1 %v3023_v35, %s2835_s6  ;;  %v256_v12 = vsel %vm224_vm0, %v2288_v38, %v2283_v45  ;;  %v3415_v35 = vsel %vm123_vm1, %v2148_v53, %v2188_v8 }
  0xca   :  { %2580 = vrot.lane.b32.xlu0 %v2881_v3, %s2835_s6  ;;  %v3429_v8 = vsel %vm123_vm1, %v2183_v21, %v2143_v37  ;;  %v1779_v48 = vpack.c.bf16 %v256_v12, %v255_v19  ;;  %v3452_v39 = vsel %vm123_vm1, %v2143_v37, %v2183_v21 }
  0xcb   :  { %v1006_v54 = vsel %vm1004_vm2, %v2293_v11, %v2298_v61  ;;  %v1005_v20 = vsel %vm1004_vm2, %v2292_v50, %v2297_v58  ;;  %1776 = vmatpush1.bf16.msra.mxu1 %v1775_v57  ;;  %v2306_v3 = vpop.permute.xlu1 %2305  ;;  %v1021_v52 = vsel %vm1004_vm2, %v2297_v58, %v2292_v50  ;;  %v1022_v38 = vsel %vm1004_vm2, %v2298_v61, %v2293_v11 }
  0xcc   :  { %v1911_v45 = vpack.c.bf16 %v1006_v54, %v1005_v20  ;;  %v2308_v9 = vunpack.i.h.bf16 %v2306_v3  ;;  %v2307_v43 = vunpack.i.l.bf16 %v2306_v3  ;;  %v2301_v33 = vpop.permute.xlu0 %2300  ;;  %1778 = vmatprep.subr.bf16.mxu1 %v1777_v46  ;;  %v1909_v53 = vpack.c.bf16 %v1022_v38, %v1021_v52 }
  0xcd   :  { %v2303_v42 = vunpack.i.h.bf16 %v2301_v33  ;;  %v2302_v55 = vunpack.i.l.bf16 %v2301_v33  ;;  %2595 = vrot.lane.b32.xlu1 %v3019_v34, %s2834_s5  ;;  %v2153_v61 = vunpack.i.h.bf16 %v3176_v14  ;;  %v3438_v46 = vsel %vm123_vm1, %v2182_v25, %v2142_v22  ;;  %v259_v33 = vld [vmem:[#allocation2 + $0x28] sm:$0xff] }
  0xce   :  { %2590 = vrot.lane.b32.xlu0 %v2913_v10, %s2834_s5  ;;  %1910 = vmatprep.subr.bf16.mxu0 %v1909_v53  ;;  %v3446_v58 = vsel %vm123_vm1, %v2142_v22, %v2182_v25  ;;  %v2152_v11 = vunpack.i.l.bf16 %v3176_v14  ;;  %v258_v25 = vld [vmem:[#allocation2 + $0x20] sm:$0xff]  ;;  %v2198_v20 = vunpack.i.h.bf16 %v3206_v26  ;;  %v1791_v51 = vpack.c.bf16 %v3429_v8, %v3438_v46 }
  0xcf   :  { %v1008_v50 = vsel %vm1004_vm2, %v2303_v42, %v2308_v9  ;;  %v1007_v57 = vsel %vm1004_vm2, %v2302_v55, %v2307_v43  ;;  %1780 = vmatpush1.bf16.msra.mxu1 %v1779_v48  ;;  %1912 = vmatpush1.bf16.msra.mxu0 %v1911_v45  ;;  %v2316_v19 = vpop.permute.xlu1 %2315  ;;  %v1023_v22 = vsel %vm1004_vm2, %v2307_v43, %v2302_v55  ;;  %v2197_v45 = vunpack.i.l.bf16 %v3206_v26 }
  0xd0   :  { %v1915_v6 = vpack.c.bf16 %v1008_v50, %v1007_v57  ;;  %v2318_v12 = vunpack.i.h.bf16 %v2316_v19  ;;  %v2317_v54 = vunpack.i.l.bf16 %v2316_v19  ;;  %v2311_v37 = vpop.permute.xlu0 %2310  ;;  %1782 = vmatprep.subr.bf16.mxu1 %v1781_v60  ;;  %v1024_v21 = vsel %vm1004_vm2, %v2308_v9, %v2303_v42 }
  0xd1   :  { %v2313_v3 = vunpack.i.h.bf16 %v2311_v37  ;;  %v2312_v52 = vunpack.i.l.bf16 %v2311_v37  ;;  %2605 = vrot.lane.b32.xlu1 %v3019_v34, %s2835_s6  ;;  %v1913_v38 = vpack.c.bf16 %v1024_v21, %v1023_v22  ;;  %v1789_v29 = vpack.c.bf16 %v3452_v39, %v3446_v58 }
  0xd2   :  { %2600 = vrot.lane.b32.xlu0 %v2913_v10, %s2835_s6  ;;  %327 = vmatmul.mubr.f32.vlgmr.msra.gmra.mrb[0].mxu1 %v258_v25  ;;  %v1793_v60 = vpack.c.bf16 %v3415_v35, %v3403_v1  ;;  %v2193_v9 = vunpack.i.h.bf16 %v3208_v27  ;;  %v3502_v62 = vsel %vm123_vm1, %v2198_v20, %v2158_v36  ;;  %v3508_v28 = vsel %vm123_vm1, %v2197_v45, %v2157_v7 }
  0xd3   :  { %v1010_v34 = vsel %vm1004_vm2, %v2313_v3, %v2318_v12  ;;  %v1009_v26 = vsel %vm1004_vm2, %v2312_v52, %v2317_v54  ;;  %1914 = vmatprep.subr.bf16.mxu0 %v1913_v38  ;;  %1784 = vmatpush1.bf16.msra.mxu1 %v1783_v5  ;;  %v2326_v10 = vpop.permute.xlu1 %2325  ;;  %v1025_v43 = vsel %vm1004_vm2, %v2317_v54, %v2312_v52  ;;  %v2168_v39 = vunpack.i.h.bf16 %v3182_v15 }
  0xd4   :  { %v1919_v53 = vpack.c.bf16 %v1010_v34, %v1009_v26  ;;  %1916 = vmatpush1.bf16.msra.mxu0 %v1915_v6  ;;  %v2328_v8 = vunpack.i.h.bf16 %v2326_v10  ;;  %v2327_v42 = vunpack.i.l.bf16 %v2326_v10  ;;  %v2321_v55 = vpop.permute.xlu0 %2320  ;;  %1786 = vmatprep.subr.bf16.mxu1 %v1785_v24  ;;  %v1026_v48 = vsel %vm1004_vm2, %v2318_v12, %v2313_v3  ;;  %v261_v34 = vld [vmem:[#allocation2 + $0x38] sm:$0xff] }
  0xd5   :  { %v2323_v46 = vunpack.i.h.bf16 %v2321_v55  ;;  %v2322_v4 = vunpack.i.l.bf16 %v2321_v55  ;;  %2615 = vrot.lane.b32.xlu1 %v3043_v41, %s2834_s5  ;;  %v1917_v59 = vpack.c.bf16 %v1026_v48, %v1025_v43  ;;  %v1795_v5 = vpack.c.bf16 %v3389_v2, %v3395_v63  ;;  %332 = vmatprep.mubr.f32.mxu1 %v2830_v0 }
  0xd6   :  { %v2192_v24 = vunpack.i.l.bf16 %v3208_v27  ;;  %2610 = vrot.lane.b32.xlu0 %v2951_v17, %s2834_s5  ;;  %v3517_v58 = vsel %vm123_vm1, %v2157_v7, %v2197_v45  ;;  %333 = vmatmul.mubr.f32.gmra.mrb[2].mxu1 %v259_v33  ;;  %v4169_v19 = vpack.c.bf16 %v3304_v56, %v3298_v44  ;;  %v260_v7 = vld [vmem:[#allocation2 + $0x30] sm:$0xff]  ;;  %v3537_v56 = vsel %vm123_vm1, %v2158_v36, %v2198_v20 }
  0xd7   :  { %v1012_v50 = vsel %vm1004_vm2, %v2323_v46, %v2328_v8  ;;  %v1011_v57 = vsel %vm1004_vm2, %v2322_v4, %v2327_v42  ;;  %1918 = vmatprep.subr.bf16.mxu0 %v1917_v59  ;;  %v2336_v22 = vpop.permute.xlu1 %2335  ;;  %v1027_v25 = vsel %vm1004_vm2, %v2327_v42, %v2322_v4  ;;  %v1028_v21 = vsel %vm1004_vm2, %v2328_v8, %v2323_v46 }
  0xd8   :  { %1788 = vmatpush1.bf16.msra.mxu1 %v4169_v19  ;;  %v1923_v6 = vpack.c.bf16 %v1012_v50, %v1011_v57  ;;  %1920 = vmatpush1.bf16.msra.mxu0 %v1919_v53  ;;  %v2338_v12 = vunpack.i.h.bf16 %v2336_v22  ;;  %v2337_v54 = vunpack.i.l.bf16 %v2336_v22  ;;  %v2331_v37 = vpop.permute.xlu0 %2330  ;;  %v1921_v44 = vpack.c.bf16 %v1028_v21, %v1027_v25 }
  0xd9   :  { %1790 = vmatprep.subr.bf16.mxu1 %v1789_v29  ;;  %v2333_v3 = vunpack.i.h.bf16 %v2331_v37  ;;  %v2332_v52 = vunpack.i.l.bf16 %v2331_v37  ;;  %2625 = vrot.lane.b32.xlu1 %v3043_v41, %s2835_s6  ;;  %v2163_v38 = vunpack.i.h.bf16 %v3184_v18  ;;  %v148_v45 = vsel %vm123_vm1, %v2192_v24, %v2152_v11 }
  0xda   :  { %338 = vmatprep.mubr.f32.mxu1 %v2830_v0  ;;  %2620 = vrot.lane.b32.xlu0 %v2951_v17, %s2835_s6  ;;  %v132_v41 = vsel %vm123_vm1, %v2152_v11, %v2192_v24  ;;  %v133_v13 = vsel %vm123_vm1, %v2153_v61, %v2193_v9  ;;  %v2162_v36 = vunpack.i.l.bf16 %v3184_v18  ;;  %v2208_v1 = vunpack.i.h.bf16 %v3216_v31 }
  0xdb   :  { %339 = vmatmul.mubr.f32.gmra.mrb[4].mxu1 %v260_v7  ;;  %v1014_v20 = vsel %vm1004_vm2, %v2333_v3, %v2338_v12  ;;  %v1013_v17 = vsel %vm1004_vm2, %v2332_v52, %v2337_v54  ;;  %1922 = vmatprep.subr.bf16.mxu0 %v1921_v44  ;;  %v2346_v29 = vpop.permute.xlu1 %2345  ;;  %v1029_v11 = vsel %vm1004_vm2, %v2337_v54, %v2332_v52  ;;  %v2203_v35 = vunpack.i.h.bf16 %v3218_v32 }
  0xdc   :  { %1792 = vmatpush1.bf16.msra.mxu1 %v1791_v51  ;;  %v1927_v26 = vpack.c.bf16 %v1014_v20, %v1013_v17  ;;  %1924 = vmatpush1.bf16.msra.mxu0 %v1923_v6  ;;  %v2348_v10 = vunpack.i.h.bf16 %v2346_v29  ;;  %v2347_v43 = vunpack.i.l.bf16 %v2346_v29  ;;  %v2341_v33 = vpop.permute.xlu0 %2340  ;;  %v1030_v53 = vsel %vm1004_vm2, %v2338_v12, %v2333_v3 }
  0xdd   :  { %1794 = vmatprep.subr.bf16.mxu1 %v1793_v60  ;;  %v149_v51 = vsel %vm123_vm1, %v2193_v9, %v2153_v61  ;;  %v2343_v8 = vunpack.i.h.bf16 %v2341_v33  ;;  %v2342_v42 = vunpack.i.l.bf16 %v2341_v33  ;;  %2635 = vrot.lane.b32.xlu1 %v3039_v40, %s2834_s5  ;;  %v1925_v55 = vpack.c.bf16 %v1030_v53, %v1029_v11 }
  0xde   :  { %344 = vmatprep.mubr.f32.mxu1 %v2830_v0  ;;  %v2202_v60 = vunpack.i.l.bf16 %v3218_v32  ;;  %2630 = vrot.lane.b32.xlu0 %v2945_v16, %s2834_s5  ;;  %v1797_v14 = vpack.c.bf16 %v133_v13, %v132_v41  ;;  %v2207_v27 = vunpack.i.l.bf16 %v3216_v31  ;;  %v1799_v63 = vpack.c.bf16 %v149_v51, %v148_v45 }
  0xdf   :  { %345 = vmatmul.mubr.f32.gmra.mrb[6].mxu1 %v261_v34  ;;  %v1016_v61 = vsel %vm1004_vm2, %v2343_v8, %v2348_v10  ;;  %v1015_v9 = vsel %vm1004_vm2, %v2342_v42, %v2347_v43  ;;  %1926 = vmatprep.subr.bf16.mxu0 %v1925_v55  ;;  %v2356_v48 = vpop.permute.xlu1 %2355  ;;  %v1031_v32 = vsel %vm1004_vm2, %v2347_v43, %v2342_v42  ;;  %v2167_v7 = vunpack.i.l.bf16 %v3182_v15  ;;  %v2770_v15 = vld [vmem:[%s4166_s0 + $0xf0] sm:$0xff] }
  0xe0   :  { %1796 = vmatpush1.bf16.msra.mxu1 %v1795_v5  ;;  %v1931_v46 = vpack.c.bf16 %v1016_v61, %v1015_v9  ;;  %1928 = vmatpush1.bf16.msra.mxu0 %v1927_v26  ;;  %v2358_v4 = vunpack.i.h.bf16 %v2356_v48  ;;  %v2357_v59 = vunpack.i.l.bf16 %v2356_v48  ;;  %v2351_v24 = vpop.permute.xlu0 %2350  ;;  %v1032_v50 = vsel %vm1004_vm2, %v2348_v10, %v2343_v8  ;;  %v2771_v48 = vld [vmem:[%s4166_s0 + $0xe8] sm:$0xff] }
  0xe1   :  { %1798 = vmatprep.subr.bf16.mxu1 %v1797_v14  ;;  %v2353_v57 = vunpack.i.h.bf16 %v2351_v24  ;;  %v2352_v19 = vunpack.i.l.bf16 %v2351_v24  ;;  %2645 = vrot.lane.b32.xlu1 %v3039_v40, %s2835_s6  ;;  %v1929_v2 = vpack.c.bf16 %v1032_v50, %v1031_v32  ;;  %v1801_v5 = vpack.c.bf16 %v3537_v56, %v3517_v58  ;;  %v2772_v32 = vld [vmem:[%s4166_s0 + $0xf8] sm:$0xff] }
  0xe2   :  { %415 = vmatprep.mubr.f32.mxu1 %v2830_v0  ;;  %2640 = vrot.lane.b32.xlu0 %v2945_v16, %s2835_s6  ;;  %v1803_v22 = vpack.c.bf16 %v3502_v62, %v3508_v28  ;;  %v136_v25 = vsel %vm123_vm1, %v2162_v36, %v2202_v60  ;;  %v137_v40 = vsel %vm123_vm1, %v2163_v38, %v2203_v35 }
  0xe3   :  { %v1018_v16 = vsel %vm1004_vm2, %v2353_v57, %v2358_v4  ;;  %v1017_v58 = vsel %vm1004_vm2, %v2352_v19, %v2357_v59  ;;  %1930 = vmatprep.subr.bf16.mxu0 %v1929_v2  ;;  %v2366_v62 = vpop.permute.xlu1 %2365  ;;  %v1033_v28 = vsel %vm1004_vm2, %v2357_v59, %v2352_v19  ;;  %v1034_v21 = vsel %vm1004_vm2, %v2358_v4, %v2353_v57  ;;  %v1038_v4 = vld [vmem:[#allocation2 + $0xa0] sm:$0xff] }
  0xe4   :  { %1800 = vmatpush1.bf16.msra.mxu1 %v1799_v63  ;;  %v1935_v6 = vpack.c.bf16 %v1018_v16, %v1017_v58  ;;  %1932 = vmatpush1.bf16.msra.mxu0 %v1931_v46  ;;  %v2368_v12 = vunpack.i.h.bf16 %v2366_v62  ;;  %v2367_v54 = vunpack.i.l.bf16 %v2366_v62  ;;  %v2361_v37 = vpop.permute.xlu0 %2360  ;;  %v1933_v44 = vpack.c.bf16 %v1034_v21, %v1033_v28  ;;  %v156_v16 = vld [vmem:[#allocation2] sm:$0xff]  ;;  %v2773_v28 = vld [vmem:[%s4166_s0 + $0x8] sm:$0xff]  ;;  %v2776_v21 = vld [vmem:[%s4166_s0 + $0x10] sm:$0xff] }
  0xe5   :  { %1802 = vmatprep.subr.bf16.mxu1 %v1801_v5  ;;  %v2363_v3 = vunpack.i.h.bf16 %v2361_v37  ;;  %v2362_v52 = vunpack.i.l.bf16 %v2361_v37  ;;  %2655 = vrot.lane.b32.xlu1 %v3064_v49, %s2834_s5  ;;  %v138_v56 = vsel %vm123_vm1, %v2167_v7, %v2207_v27  ;;  %v152_v45 = vsel %vm123_vm1, %v2202_v60, %v2162_v36  ;;  %v2775_v37 = vld [vmem:[%s4166_s0] sm:$0xff] }
  0xe6   :  { %v153_v41 = vsel %vm123_vm1, %v2203_v35, %v2163_v38  ;;  %2650 = vrot.lane.b32.xlu0 %v2983_v23, %s2834_s5  ;;  %v1805_v13 = vpack.c.bf16 %v137_v40, %v136_v25  ;;  %v139_v20 = vsel %vm123_vm1, %v2168_v39, %v2208_v1  ;;  %1934 = vmatprep.subr.bf16.mxu0 %v1933_v44 }
  0xe7   :  { %v1020_v17 = vsel %vm1004_vm2, %v2363_v3, %v2368_v12  ;;  %v1019_v18 = vsel %vm1004_vm2, %v2362_v52, %v2367_v54  ;;  %v2376_v38 = vpop.permute.xlu1 %2375  ;;  %v1035_v36 = vsel %vm1004_vm2, %v2367_v54, %v2362_v52  ;;  %v1036_v10 = vsel %vm1004_vm2, %v2368_v12, %v2363_v3  ;;  %v1039_v52 = vld [vmem:[#allocation2 + $0xa8] sm:$0xff] }
  0xe8   :  { %1804 = vmatpush1.bf16.msra.mxu1 %v1803_v22  ;;  %v1939_v29 = vpack.c.bf16 %v1020_v17, %v1019_v18  ;;  %1936 = vmatpush1.bf16.msra.mxu0 %v1935_v6  ;;  %v2378_v11 = vunpack.i.h.bf16 %v2376_v38  ;;  %v2377_v34 = vunpack.i.l.bf16 %v2376_v38  ;;  %v2371_v26 = vpop.permute.xlu0 %2370  ;;  %v1937_v53 = vpack.c.bf16 %v1036_v10, %v1035_v36  ;;  %v2774_v6 = vld [vmem:[%s4166_s0 + $0x18] sm:$0xff] }
  0xe9   :  { %1806 = vmatprep.subr.bf16.mxu1 %v1805_v13  ;;  %v2373_v43 = vunpack.i.h.bf16 %v2371_v26  ;;  %v2372_v33 = vunpack.i.l.bf16 %v2371_v26  ;;  %2665 = vrot.lane.b32.xlu1 %v3064_v49, %s2835_s6  ;;  %v1807_v51 = vpack.c.bf16 %v153_v41, %v152_v45  ;;  %v155_v8 = vsel %vm123_vm1, %v2208_v1, %v2168_v39  ;;  %v2769_v49 = vld [vmem:[%s4166_s0 + $0xe0] sm:$0xff]  ;;  %v2778_v26 = vld [vmem:[%s4166_s0 + $0x38] sm:$0xff] }
  0xea   :  { %v154_v42 = vsel %vm123_vm1, %v2207_v27, %v2167_v7  ;;  %2660 = vrot.lane.b32.xlu0 %v2983_v23, %s2835_s6  ;;  %v1809_v55 = vpack.c.bf16 %v139_v20, %v138_v56  ;;  %v3672_v35 = vpack.i.bf16 %v2770_v15, %v2769_v49  ;;  %1938 = vmatprep.subr.bf16.mxu0 %v1937_v53 }
  0xeb   :  { %v2386_v31 = vpop.permute.xlu1 %2385  ;;  %v505_v39 = vsel %vm504_vm3, %v2372_v33, %v2377_v34  ;;  %v506_v14 = vsel %vm504_vm3, %v2373_v43, %v2378_v11  ;;  %v1811_v9 = vpack.c.bf16 %v155_v8, %v154_v42  ;;  %v3687_v46 = vpack.i.bf16 %v2772_v32, %v2771_v48  ;;  %v1040_v32 = vld [vmem:[#allocation2 + $0xb0] sm:$0xff] }
  0xec   :  { %1808 = vmatpush1.bf16.msra.mxu1 %v1807_v51  ;;  %1940 = vmatpush1.bf16.msra.mxu0 %v1939_v29  ;;  %v2388_v1 = vunpack.i.h.bf16 %v2386_v31  ;;  %v2387_v23 = vunpack.i.l.bf16 %v2386_v31  ;;  %v2381_v60 = vpop.permute.xlu0 %2380  ;;  %v522_v59 = vsel %vm504_vm3, %v2378_v11, %v2373_v43  ;;  %v521_v24 = vsel %vm504_vm3, %v2377_v34, %v2372_v33  ;;  %v2777_v34 = vld [vmem:[%s4166_s0 + $0x28] sm:$0xff]  ;;  %v2779_v43 = vld [vmem:[%s4166_s0 + $0x20] sm:$0xff]  ;;  %v2780_v33 = vld [vmem:[%s4166_s0 + $0x30] sm:$0xff] }
  0xed   :  { %1810 = vmatprep.subr.bf16.mxu1 %v1809_v55  ;;  %v2383_v27 = vunpack.i.h.bf16 %v2381_v60  ;;  %v2382_v61 = vunpack.i.l.bf16 %v2381_v60  ;;  %2675 = vrot.lane.b32.xlu1 %v3059_v47, %s2834_s5  ;;  %v1813_v47 = vpack.c.bf16 %v506_v14, %v505_v39  ;;  %v2694_v12 = vpack.i.bf16 %v2774_v6, %v2773_v28  ;;  %v157_v51 = vld [vmem:[#allocation2 + $0x8] sm:$0xff]  ;;  %v2786_v28 = vld [vmem:[%s4166_s0 + $0x78] sm:$0xff] }
  0xee   :  { %2670 = vrot.lane.b32.xlu0 %v3672_v35, %s2834_s5  ;;  %v1815_v54 = vpack.c.bf16 %v522_v59, %v521_v24  ;;  %v2689_v3 = vpack.i.bf16 %v2776_v21, %v2775_v37  ;;  %v2704_v10 = vpack.i.bf16 %v2778_v26, %v2777_v34  ;;  %v2699_v53 = vpack.i.bf16 %v2780_v33, %v2779_v43  ;;  %v2784_v59 = vld [vmem:[%s4166_s0 + $0x50] sm:$0xff]  ;;  %v159_v21 = vld [vmem:[#allocation2 + $0x18] sm:$0xff] }
  0xef   :  { %v1205_v50 = vsel %vm1203_vm4, %v2383_v27, %v2388_v1  ;;  %v1204_v57 = vsel %vm1203_vm4, %v2382_v61, %v2387_v23  ;;  %v2396_v19 = vpop.permute.xlu1 %2395  ;;  %v1220_v2 = vsel %vm1203_vm4, %v2387_v23, %v2382_v61  ;;  %v1221_v63 = vsel %vm1203_vm4, %v2388_v1, %v2383_v27  ;;  %1107 = vmatmul.mubr.f32.vlgmr.msra.gmra.mrb[0].mxu0 %v1038_v4  ;;  %v2781_v61 = vld [vmem:[%s4166_s0 + $0x48] sm:$0xff]  ;;  %v2783_v4 = vld [vmem:[%s4166_s0 + $0x40] sm:$0xff]  ;;  %v1041_v26 = vld [vmem:[#allocation2 + $0xb8] sm:$0xff] }
  0xf0   :  { %1812 = vmatpush1.bf16.msra.mxu1 %v1811_v9  ;;  %v1943_v5 = vpack.c.bf16 %v1205_v50, %v1204_v57  ;;  %v2398_v22 = vunpack.i.h.bf16 %v2396_v19  ;;  %v2397_v25 = vunpack.i.l.bf16 %v2396_v19  ;;  %v2391_v40 = vpop.permute.xlu0 %2390  ;;  %v1941_v7 = vpack.c.bf16 %v1221_v63, %v1220_v2  ;;  %1112 = vmatprep.mubr.f32.mxu0 %v2830_v0  ;;  %v2782_v9 = vld [vmem:[%s4166_s0 + $0x58] sm:$0xff]  ;;  %v2792_v43 = vld [vmem:[%s4166_s0 + $0x90] sm:$0xff] }
  0xf1   :  { %1814 = vmatprep.subr.bf16.mxu1 %v1813_v47  ;;  %v2393_v58 = vunpack.i.h.bf16 %v2391_v40  ;;  %v2392_v62 = vunpack.i.l.bf16 %v2391_v40  ;;  %2685 = vrot.lane.b32.xlu1 %v3687_v46, %s2835_s6  ;;  %v2714_v48 = vpack.i.bf16 %v2782_v9, %v2781_v61  ;;  %v2709_v24 = vpack.i.bf16 %v2784_v59, %v2783_v4  ;;  %v158_v47 = vld [vmem:[#allocation2 + $0x10] sm:$0xff]  ;;  %v2795_v9 = vld [vmem:[%s4166_s0 + $0xa0] sm:$0xff] }
  0xf2   :  { %2680 = vrot.lane.b32.xlu0 %v3672_v35, %s2835_s6  ;;  %1942 = vmatprep.subr.bf16.mxu0 %v1941_v7 }
  0xf3   :  { %v524_v44 = vsel %vm504_vm3, %v2398_v22, %v2393_v58  ;;  %v523_v56 = vsel %vm504_vm3, %v2397_v25, %v2392_v62  ;;  %416 = vmatmul.mubr.f32.vlgmr.msra.gmra.mrb[0].mxu1 %v156_v16  ;;  %1944 = vmatpush1.bf16.msra.mxu0 %v1943_v5  ;;  %v2406_v45 = vpop.permute.xlu1 %2405  ;;  %v507_v41 = vsel %vm504_vm3, %v2392_v62, %v2397_v25  ;;  %v2785_v62 = vld [vmem:[%s4166_s0 + $0x68] sm:$0xff] }
  0xf4   :  { %v1819_v13 = vpack.c.bf16 %v524_v44, %v523_v56  ;;  %1816 = vmatpush1.bf16.msra.mxu1 %v1815_v54  ;;  %v2408_v20 = vunpack.i.h.bf16 %v2406_v45  ;;  %v2407_v17 = vunpack.i.l.bf16 %v2406_v45  ;;  %v2401_v18 = vpop.permute.xlu0 %2400  ;;  %v508_v38 = vsel %vm504_vm3, %v2393_v58, %v2398_v22  ;;  %421 = vmatprep.mubr.f32.mxu1 %v2830_v0  ;;  %v2788_v54 = vld [vmem:[%s4166_s0 + $0x70] sm:$0xff] }
  0xf5   :  { %v2403_v36 = vunpack.i.h.bf16 %v2401_v18  ;;  %v2402_v29 = vunpack.i.l.bf16 %v2401_v18  ;;  %2695 = vrot.lane.b32.xlu1 %v2694_v12, %s2836_s24  ;;  %v1817_v11 = vpack.c.bf16 %v508_v38, %v507_v41  ;;  %1113 = vmatmul.mubr.f32.gmra.mrb[2].mxu0 %v1039_v52  ;;  %v2724_v6 = vpack.i.bf16 %v2786_v28, %v2785_v62  ;;  %v2787_v12 = vld [vmem:[%s4166_s0 + $0x60] sm:$0xff]  ;;  %v2800_v62 = vld [vmem:[%s4166_s0 + $0xd0] sm:$0xff] }
  0xf6   :  { %2690 = vrot.lane.b32.xlu0 %v2689_v3, %s2836_s24  ;;  %1118 = vmatprep.mubr.f32.mxu0 %v2830_v0  ;;  %v2719_v37 = vpack.i.bf16 %v2788_v54, %v2787_v12 }
  0xf7   :  { %v1207_v8 = vsel %vm1203_vm4, %v2403_v36, %v2408_v20  ;;  %v1206_v42 = vsel %vm1203_vm4, %v2402_v29, %v2407_v17  ;;  %1818 = vmatprep.subr.bf16.mxu1 %v1817_v11  ;;  %v2416_v55 = vpop.permute.xlu1 %2415  ;;  %v1222_v49 = vsel %vm1203_vm4, %v2407_v17, %v2402_v29  ;;  %v1223_v15 = vsel %vm1203_vm4, %v2408_v20, %v2403_v36  ;;  %v2789_v29 = vld [vmem:[%s4166_s0 + $0x88] sm:$0xff]  ;;  %v2790_v11 = vld [vmem:[%s4166_s0 + $0x98] sm:$0xff] }
  0xf8   :  { %v1947_v31 = vpack.c.bf16 %v1207_v8, %v1206_v42  ;;  %1820 = vmatpush1.bf16.msra.mxu1 %v1819_v13  ;;  %v2418_v39 = vunpack.i.h.bf16 %v2416_v55  ;;  %v2417_v1 = vunpack.i.l.bf16 %v2416_v55  ;;  %v2411_v23 = vpop.permute.xlu0 %2410  ;;  %v1945_v60 = vpack.c.bf16 %v1223_v15, %v1222_v49 }
  0xf9   :  { %v2413_v14 = vunpack.i.h.bf16 %v2411_v23  ;;  %v2412_v27 = vunpack.i.l.bf16 %v2411_v23  ;;  %2705 = vrot.lane.b32.xlu1 %v2704_v10, %s2836_s24  ;;  %422 = vmatmul.mubr.f32.gmra.mrb[2].mxu1 %v157_v51  ;;  %v2734_v34 = vpack.i.bf16 %v2790_v11, %v2789_v29  ;;  %v2791_v10 = vld [vmem:[%s4166_s0 + $0x80] sm:$0xff] }
  0xfa   :  { %2700 = vrot.lane.b32.xlu0 %v2699_v53, %s2836_s24  ;;  %1946 = vmatprep.subr.bf16.mxu0 %v1945_v60  ;;  %v2729_v33 = vpack.i.bf16 %v2792_v43, %v2791_v10 }
  0xfb   :  { %v526_v50 = vsel %vm504_vm3, %v2418_v39, %v2413_v14  ;;  %v525_v57 = vsel %vm504_vm3, %v2417_v1, %v2412_v27  ;;  %1948 = vmatpush1.bf16.msra.mxu0 %v1947_v31  ;;  %v2426_v19 = vpop.permute.xlu1 %2425  ;;  %v509_v2 = vsel %vm504_vm3, %v2412_v27, %v2417_v1  ;;  %v510_v63 = vsel %vm504_vm3, %v2413_v14, %v2418_v39  ;;  %v2793_v14 = vld [vmem:[%s4166_s0 + $0xa8] sm:$0xff]  ;;  %v2794_v27 = vld [vmem:[%s4166_s0 + $0xb8] sm:$0xff] }
  0xfc   :  { %v1823_v5 = vpack.c.bf16 %v526_v50, %v525_v57  ;;  %v2428_v22 = vunpack.i.h.bf16 %v2426_v19  ;;  %v2427_v25 = vunpack.i.l.bf16 %v2426_v19  ;;  %v2421_v40 = vpop.permute.xlu0 %2420  ;;  %v1821_v7 = vpack.c.bf16 %v510_v63, %v509_v2  ;;  %427 = vmatprep.mubr.f32.mxu1 %v2830_v0  ;;  %1119 = vmatmul.mubr.f32.gmra.mrb[4].mxu0 %v1040_v32 }
  0xfd   :  { %v2423_v16 = vunpack.i.h.bf16 %v2421_v40  ;;  %v2422_v58 = vunpack.i.l.bf16 %v2421_v40  ;;  %2715 = vrot.lane.b32.xlu1 %v2714_v48, %s2836_s24  ;;  %428 = vmatmul.mubr.f32.gmra.mrb[4].mxu1 %v158_v47  ;;  %v2744_v61 = vpack.i.bf16 %v2794_v27, %v2793_v14  ;;  %v2796_v48 = vld [vmem:[%s4166_s0 + $0xb0] sm:$0xff]  ;;  %v2797_v40 = vld [vmem:[%s4166_s0 + $0xc8] sm:$0xff] }
  0xfe   :  { %2710 = vrot.lane.b32.xlu0 %v2709_v24, %s2836_s24  ;;  %1822 = vmatprep.subr.bf16.mxu1 %v1821_v7  ;;  %v2739_v32 = vpack.i.bf16 %v2796_v48, %v2795_v9  ;;  %v2798_v7 = vld [vmem:[%s4166_s0 + $0xd8] sm:$0xff] }
  0xff   :  { %v1209_v3 = vsel %vm1203_vm4, %v2423_v16, %v2428_v22  ;;  %v1208_v52 = vsel %vm1203_vm4, %v2422_v58, %v2427_v25  ;;  %1824 = vmatpush1.bf16.msra.mxu1 %v1823_v5  ;;  %v2436_v44 = vpop.permute.xlu1 %2435  ;;  %v1224_v56 = vsel %vm1203_vm4, %v2427_v25, %v2422_v58  ;;  %v1225_v45 = vsel %vm1203_vm4, %v2428_v22, %v2423_v16  ;;  %v2799_v58 = vld [vmem:[%s4166_s0 + $0xc0] sm:$0xff] }
 0x100   :  { %v1951_v41 = vpack.c.bf16 %v1209_v3, %v1208_v52  ;;  %v2438_v13 = vunpack.i.h.bf16 %v2436_v44  ;;  %v2437_v20 = vunpack.i.l.bf16 %v2436_v44  ;;  %v2431_v17 = vpop.permute.xlu0 %2430  ;;  %v1949_v18 = vpack.c.bf16 %v1225_v45, %v1224_v56  ;;  %433 = vmatprep.mubr.f32.mxu1 %v2830_v0  ;;  %1124 = vmatprep.mubr.f32.mxu0 %v2830_v0 }
 0x101   :  { %v2433_v38 = vunpack.i.h.bf16 %v2431_v17  ;;  %v2432_v36 = vunpack.i.l.bf16 %v2431_v17  ;;  %2725 = vrot.lane.b32.xlu1 %v2724_v6, %s2836_s24  ;;  %434 = vmatmul.mubr.f32.gmra.mrb[6].mxu1 %v159_v21  ;;  %v2754_v16 = vpack.i.bf16 %v2798_v7, %v2797_v40  ;;  %v2749_v28 = vpack.i.bf16 %v2800_v62, %v2799_v58 }
 0x102   :  { %2720 = vrot.lane.b32.xlu0 %v2719_v37, %s2836_s24  ;;  %1950 = vmatprep.subr.bf16.mxu0 %v1949_v18 }
 0x103   :  { %v528_v53 = vsel %vm504_vm3, %v2438_v13, %v2433_v38  ;;  %v527_v51 = vsel %vm504_vm3, %v2437_v20, %v2432_v36  ;;  %1952 = vmatpush1.bf16.msra.mxu0 %v1951_v41  ;;  %v2446_v8 = vpop.permute.xlu1 %2445  ;;  %v511_v42 = vsel %vm504_vm3, %v2432_v36, %v2437_v20  ;;  %v512_v55 = vsel %vm504_vm3, %v2433_v38, %v2438_v13 }
 0x104   :  { %v1827_v49 = vpack.c.bf16 %v528_v53, %v527_v51  ;;  %v2448_v15 = vunpack.i.h.bf16 %v2446_v8  ;;  %v2447_v31 = vunpack.i.l.bf16 %v2446_v8  ;;  %v2441_v39 = vpop.permute.xlu0 %2440  ;;  %v1825_v1 = vpack.c.bf16 %v512_v55, %v511_v42  ;;  %606 = vmatprep.mubr.f32.mxu1 %v2830_v0  ;;  %1125 = vmatmul.mubr.f32.gmra.mrb[6].mxu0 %v1041_v26 }
 0x105   :  { %v2443_v23 = vunpack.i.h.bf16 %v2441_v39  ;;  %v2442_v60 = vunpack.i.l.bf16 %v2441_v39  ;;  %2735 = vrot.lane.b32.xlu1 %v2734_v34, %s2836_s24  ;;  %1305 = vmatprep.mubr.f32.mxu0 %v2830_v0 }
 0x106   :  { %2730 = vrot.lane.b32.xlu0 %v2729_v33, %s2836_s24  ;;  %1826 = vmatprep.subr.bf16.mxu1 %v1825_v1 }
 0x107   :  { %v1211_v4 = vsel %vm1203_vm4, %v2443_v23, %v2448_v15  ;;  %v1210_v59 = vsel %vm1203_vm4, %v2442_v60, %v2447_v31  ;;  %1828 = vmatpush1.bf16.msra.mxu1 %v1827_v49  ;;  %v2456_v24 = vpop.permute.xlu1 %2455  ;;  %v1226_v47 = vsel %vm1203_vm4, %v2447_v31, %v2442_v60  ;;  %v1227_v50 = vsel %vm1203_vm4, %v2448_v15, %v2443_v23 }
 0x108   :  { %v1955_v57 = vpack.c.bf16 %v1211_v4, %v1210_v59  ;;  %v2458_v19 = vunpack.i.h.bf16 %v2456_v24  ;;  %v2457_v2 = vunpack.i.l.bf16 %v2456_v24  ;;  %v2451_v63 = vpop.permute.xlu0 %2450  ;;  %v1953_v5 = vpack.c.bf16 %v1227_v50, %v1226_v47 }
 0x109   :  { %v2453_v22 = vunpack.i.h.bf16 %v2451_v63  ;;  %v2452_v25 = vunpack.i.l.bf16 %v2451_v63  ;;  %2745 = vrot.lane.b32.xlu1 %v2744_v61, %s2836_s24 }
 0x10a   :  { %2740 = vrot.lane.b32.xlu0 %v2739_v32, %s2836_s24  ;;  %1954 = vmatprep.subr.bf16.mxu0 %v1953_v5 }
 0x10b   :  { %v530_v6 = vsel %vm504_vm3, %v2458_v19, %v2453_v22  ;;  %v529_v12 = vsel %vm504_vm3, %v2457_v2, %v2452_v25  ;;  %1956 = vmatpush1.bf16.msra.mxu0 %v1955_v57  ;;  %v2466_v54 = vpop.permute.xlu1 %2465  ;;  %v513_v37 = vsel %vm504_vm3, %v2452_v25, %v2457_v2  ;;  %v514_v21 = vsel %vm504_vm3, %v2453_v22, %v2458_v19 }
 0x10c   :  { %v1831_v3 = vpack.c.bf16 %v530_v6, %v529_v12  ;;  %v2468_v52 = vunpack.i.h.bf16 %v2466_v54  ;;  %v2467_v44 = vunpack.i.l.bf16 %v2466_v54  ;;  %v2461_v56 = vpop.permute.xlu0 %2460  ;;  %v1829_v45 = vpack.c.bf16 %v514_v21, %v513_v37 }
 0x10d   :  { %v2463_v41 = vunpack.i.h.bf16 %v2461_v56  ;;  %v2462_v13 = vunpack.i.l.bf16 %v2461_v56  ;;  %2755 = vrot.lane.b32.xlu1 %v2754_v16, %s2836_s24 }
 0x10e   :  { %2750 = vrot.lane.b32.xlu0 %v2749_v28, %s2836_s24  ;;  %1830 = vmatprep.subr.bf16.mxu1 %v1829_v45 }
 0x10f   :  { %v1213_v20 = vsel %vm1203_vm4, %v2463_v41, %v2468_v52  ;;  %v1212_v17 = vsel %vm1203_vm4, %v2462_v13, %v2467_v44  ;;  %1832 = vmatpush1.bf16.msra.mxu1 %v1831_v3  ;;  %v2476_v18 = vpop.permute.xlu1 %2475  ;;  %v1228_v38 = vsel %vm1203_vm4, %v2467_v44, %v2462_v13  ;;  %v1229_v36 = vsel %vm1203_vm4, %v2468_v52, %v2463_v41 }
 0x110   :  { %v1959_v29 = vpack.c.bf16 %v1213_v20, %v1212_v17  ;;  %v2478_v11 = vunpack.i.h.bf16 %v2476_v18  ;;  %v2477_v34 = vunpack.i.l.bf16 %v2476_v18  ;;  %v2471_v26 = vpop.permute.xlu0 %2470  ;;  %v1957_v10 = vpack.c.bf16 %v1229_v36, %v1228_v38 }
 0x111   :  { %v2473_v43 = vunpack.i.h.bf16 %v2471_v26  ;;  %v2472_v33 = vunpack.i.l.bf16 %v2471_v26  ;;  %2765 = vrot.lane.b32.xlu1 %v3687_v46, %s2836_s24 }
 0x112   :  { %2760 = vrot.lane.b32.xlu0 %v3672_v35, %s2836_s24  ;;  %1958 = vmatprep.subr.bf16.mxu0 %v1957_v10 }
 0x113   :  { %v532_v53 = vsel %vm504_vm3, %v2478_v11, %v2473_v43  ;;  %v531_v51 = vsel %vm504_vm3, %v2477_v34, %v2472_v33  ;;  %1960 = vmatpush1.bf16.msra.mxu0 %v1959_v29  ;;  %v2486_v8 = vpop.permute.xlu1 %2485  ;;  %v515_v42 = vsel %vm504_vm3, %v2472_v33, %v2477_v34  ;;  %v516_v55 = vsel %vm504_vm3, %v2473_v43, %v2478_v11 }
 0x114   :  { %v1835_v49 = vpack.c.bf16 %v532_v53, %v531_v51  ;;  %v2488_v46 = vunpack.i.h.bf16 %v2486_v8  ;;  %v2487_v15 = vunpack.i.l.bf16 %v2486_v8  ;;  %v2481_v31 = vpop.permute.xlu0 %2480  ;;  %v1833_v35 = vpack.c.bf16 %v516_v55, %v515_v42  ;;  %v538_v42 = vld [vmem:[#allocation2 + $0x40] sm:$0xff] }
 0x115   :  { %v2483_v39 = vunpack.i.h.bf16 %v2481_v31  ;;  %v2482_v1 = vunpack.i.l.bf16 %v2481_v31 }
 0x116   :  { %1834 = vmatprep.subr.bf16.mxu1 %v1833_v35 }
 0x117   :  { %v1215_v23 = vsel %vm1203_vm4, %v2483_v39, %v2488_v46  ;;  %v1214_v60 = vsel %vm1203_vm4, %v2482_v1, %v2487_v15  ;;  %1836 = vmatpush1.bf16.msra.mxu1 %v1835_v49  ;;  %v2496_v14 = vpop.permute.xlu1 %2495  ;;  %v1230_v27 = vsel %vm1203_vm4, %v2487_v15, %v2482_v1  ;;  %v1231_v61 = vsel %vm1203_vm4, %v2488_v46, %v2483_v39 }
 0x118   :  { %v1963_v9 = vpack.c.bf16 %v1215_v23, %v1214_v60  ;;  %v2498_v48 = vunpack.i.h.bf16 %v2496_v14  ;;  %v2497_v32 = vunpack.i.l.bf16 %v2496_v14  ;;  %v2491_v4 = vpop.permute.xlu0 %2490  ;;  %v1961_v59 = vpack.c.bf16 %v1231_v61, %v1230_v27  ;;  %v1237_v61 = vld [vmem:[#allocation2 + $0xc0] sm:$0xff] }
 0x119   :  { %v2493_v24 = vunpack.i.h.bf16 %v2491_v4  ;;  %v2492_v47 = vunpack.i.l.bf16 %v2491_v4 }
 0x11a   :  { %1962 = vmatprep.subr.bf16.mxu0 %v1961_v59 }
 0x11b   :  { %v534_v50 = vsel %vm504_vm3, %v2498_v48, %v2493_v24  ;;  %v533_v57 = vsel %vm504_vm3, %v2497_v32, %v2492_v47  ;;  %1964 = vmatpush1.bf16.msra.mxu0 %v1963_v9  ;;  %v2506_v19 = vpop.permute.xlu1 %2505  ;;  %v517_v2 = vsel %vm504_vm3, %v2492_v47, %v2497_v32  ;;  %v518_v63 = vsel %vm504_vm3, %v2493_v24, %v2498_v48 }
 0x11c   :  { %v1839_v5 = vpack.c.bf16 %v534_v50, %v533_v57  ;;  %v2508_v22 = vunpack.i.h.bf16 %v2506_v19  ;;  %v2507_v25 = vunpack.i.l.bf16 %v2506_v19  ;;  %v2501_v40 = vpop.permute.xlu0 %2500  ;;  %v1837_v7 = vpack.c.bf16 %v518_v63, %v517_v2  ;;  %v539_v50 = vld [vmem:[#allocation2 + $0x48] sm:$0xff] }
 0x11d   :  { %v2503_v16 = vunpack.i.h.bf16 %v2501_v40  ;;  %v2502_v58 = vunpack.i.l.bf16 %v2501_v40 }
 0x11e   :  { %1838 = vmatprep.subr.bf16.mxu1 %v1837_v7 }
 0x11f   :  { %v1217_v62 = vsel %vm1203_vm4, %v2503_v16, %v2508_v22  ;;  %v1216_v28 = vsel %vm1203_vm4, %v2502_v58, %v2507_v25  ;;  %1840 = vmatpush1.bf16.msra.mxu1 %v1839_v5  ;;  %v2516_v6 = vpop.permute.xlu1 %2515  ;;  %v1232_v12 = vsel %vm1203_vm4, %v2507_v25, %v2502_v58  ;;  %v1233_v54 = vsel %vm1203_vm4, %v2508_v22, %v2503_v16  ;;  %v1238_v22 = vld [vmem:[#allocation2 + $0xc8] sm:$0xff] }
 0x120   :  { %v1967_v37 = vpack.c.bf16 %v1217_v62, %v1216_v28  ;;  %v2518_v21 = vunpack.i.h.bf16 %v2516_v6  ;;  %v2517_v3 = vunpack.i.l.bf16 %v2516_v6  ;;  %v2511_v52 = vpop.permute.xlu0 %2510  ;;  %v1965_v44 = vpack.c.bf16 %v1233_v54, %v1232_v12  ;;  %v540_v6 = vld [vmem:[#allocation2 + $0x50] sm:$0xff] }
 0x121   :  { %v2513_v56 = vunpack.i.h.bf16 %v2511_v52  ;;  %v2512_v45 = vunpack.i.l.bf16 %v2511_v52  ;;  %v1239_v52 = vld [vmem:[#allocation2 + $0xd0] sm:$0xff] }
 0x122   :  { %1966 = vmatprep.subr.bf16.mxu0 %v1965_v44 }
 0x123   :  { %v536_v41 = vsel %vm504_vm3, %v2518_v21, %v2513_v56  ;;  %v535_v13 = vsel %vm504_vm3, %v2517_v3, %v2512_v45  ;;  %1968 = vmatpush1.bf16.msra.mxu0 %v1967_v37  ;;  %v2526_v20 = vpop.permute.xlu1 %2525  ;;  %v519_v17 = vsel %vm504_vm3, %v2512_v45, %v2517_v3  ;;  %v520_v18 = vsel %vm504_vm3, %v2513_v56, %v2518_v21 }
 0x124   :  { %v1843_v38 = vpack.c.bf16 %v536_v41, %v535_v13  ;;  %v2528_v36 = vunpack.i.h.bf16 %v2526_v20  ;;  %v2527_v29 = vunpack.i.l.bf16 %v2526_v20  ;;  %v2521_v11 = vpop.permute.xlu0 %2520  ;;  %v1841_v34 = vpack.c.bf16 %v520_v18, %v519_v17  ;;  %v541_v18 = vld [vmem:[#allocation2 + $0x58] sm:$0xff] }
 0x125   :  { %v2523_v26 = vunpack.i.h.bf16 %v2521_v11  ;;  %v2522_v10 = vunpack.i.l.bf16 %v2521_v11 }
 0x126   :  { %1842 = vmatprep.subr.bf16.mxu1 %v1841_v34 }
 0x127   :  { %v1219_v43 = vsel %vm1203_vm4, %v2523_v26, %v2528_v36  ;;  %v1218_v33 = vsel %vm1203_vm4, %v2522_v10, %v2527_v29  ;;  %1844 = vmatpush1.bf16.msra.mxu1 %v1843_v38  ;;  %v2536_v53 = vpop.permute.xlu1 %2535  ;;  %v1234_v51 = vsel %vm1203_vm4, %v2527_v29, %v2522_v10  ;;  %v1235_v8 = vsel %vm1203_vm4, %v2528_v36, %v2523_v26  ;;  %v1240_v26 = vld [vmem:[#allocation2 + $0xd8] sm:$0xff] }
 0x128   :  { %v1971_v55 = vpack.c.bf16 %v1219_v43, %v1218_v33  ;;  %v2538_v49 = vunpack.i.h.bf16 %v2536_v53  ;;  %v2537_v46 = vunpack.i.l.bf16 %v2536_v53  ;;  %v2531_v15 = vpop.permute.xlu0 %2530  ;;  %v1969_v31 = vpack.c.bf16 %v1235_v8, %v1234_v51 }
 0x129   :  { %v2533_v35 = vunpack.i.h.bf16 %v2531_v15  ;;  %v2532_v39 = vunpack.i.l.bf16 %v2531_v15 }
 0x12a   :  { %1970 = vmatprep.subr.bf16.mxu0 %v1969_v31  ;;  %607 = vmatmul.mubr.f32.vlgmr.msra.gmra.mrb[0].mxu1 %v538_v42 }
 0x12b   :  { %v721_v1 = vsel %vm703_vm5, %v2538_v49, %v2533_v35  ;;  %v720_v23 = vsel %vm703_vm5, %v2537_v46, %v2532_v39  ;;  %1972 = vmatpush1.bf16.msra.mxu0 %v1971_v55  ;;  %v2546_v60 = vpop.permute.xlu1 %2545  ;;  %v704_v14 = vsel %vm703_vm5, %v2532_v39, %v2537_v46  ;;  %v705_v27 = vsel %vm703_vm5, %v2533_v35, %v2538_v49 }
 0x12c   :  { %v1847_v9 = vpack.c.bf16 %v721_v1, %v720_v23  ;;  %v2548_v48 = vunpack.i.h.bf16 %v2546_v60  ;;  %v2547_v32 = vunpack.i.l.bf16 %v2546_v60  ;;  %v2541_v4 = vpop.permute.xlu0 %2540  ;;  %v1845_v59 = vpack.c.bf16 %v705_v27, %v704_v14  ;;  %612 = vmatprep.mubr.f32.mxu1 %v2830_v0 }
 0x12d   :  { %v2543_v24 = vunpack.i.h.bf16 %v2541_v4  ;;  %v2542_v47 = vunpack.i.l.bf16 %v2541_v4 }
 0x12e   :  { %1846 = vmatprep.subr.bf16.mxu1 %v1845_v59  ;;  %1306 = vmatmul.mubr.f32.vlgmr.msra.gmra.mrb[0].mxu0 %v1237_v61 }
 0x12f   :  { %v1404_v57 = vsel %vm1402_vm6, %v2543_v24, %v2548_v48  ;;  %v1403_v19 = vsel %vm1402_vm6, %v2542_v47, %v2547_v32  ;;  %1848 = vmatpush1.bf16.msra.mxu1 %v1847_v9  ;;  %v2556_v2 = vpop.permute.xlu1 %2555  ;;  %v1419_v63 = vsel %vm1402_vm6, %v2547_v32, %v2542_v47  ;;  %v1420_v5 = vsel %vm1402_vm6, %v2548_v48, %v2543_v24 }
 0x130   :  { %v1975_v25 = vpack.c.bf16 %v1404_v57, %v1403_v19  ;;  %v2558_v40 = vunpack.i.h.bf16 %v2556_v2  ;;  %v2557_v7 = vunpack.i.l.bf16 %v2556_v2  ;;  %v2551_v16 = vpop.permute.xlu0 %2550  ;;  %v1973_v58 = vpack.c.bf16 %v1420_v5, %v1419_v63  ;;  %613 = vmatmul.mubr.f32.gmra.mrb[2].mxu1 %v539_v50  ;;  %1311 = vmatprep.mubr.f32.mxu0 %v2830_v0 }
 0x131   :  { %v2553_v62 = vunpack.i.h.bf16 %v2551_v16  ;;  %v2552_v28 = vunpack.i.l.bf16 %v2551_v16  ;;  %618 = vmatprep.mubr.f32.mxu1 %v2830_v0 }
 0x132   :  { %1974 = vmatprep.subr.bf16.mxu0 %v1973_v58  ;;  %1312 = vmatmul.mubr.f32.gmra.mrb[2].mxu0 %v1238_v22 }
 0x133   :  { %v723_v12 = vsel %vm703_vm5, %v2558_v40, %v2553_v62  ;;  %v722_v54 = vsel %vm703_vm5, %v2557_v7, %v2552_v28  ;;  %1976 = vmatpush1.bf16.msra.mxu0 %v1975_v25  ;;  %v2566_v37 = vpop.permute.xlu1 %2565  ;;  %v706_v21 = vsel %vm703_vm5, %v2552_v28, %v2557_v7  ;;  %v707_v3 = vsel %vm703_vm5, %v2553_v62, %v2558_v40 }
 0x134   :  { %v1851_v44 = vpack.c.bf16 %v723_v12, %v722_v54  ;;  %v2568_v56 = vunpack.i.h.bf16 %v2566_v37  ;;  %v2567_v45 = vunpack.i.l.bf16 %v2566_v37  ;;  %v2561_v41 = vpop.permute.xlu0 %2560  ;;  %v1849_v13 = vpack.c.bf16 %v707_v3, %v706_v21  ;;  %619 = vmatmul.mubr.f32.gmra.mrb[4].mxu1 %v540_v6  ;;  %1317 = vmatprep.mubr.f32.mxu0 %v2830_v0 }
 0x135   :  { %v2563_v20 = vunpack.i.h.bf16 %v2561_v41  ;;  %v2562_v17 = vunpack.i.l.bf16 %v2561_v41  ;;  %624 = vmatprep.mubr.f32.mxu1 %v2830_v0 }
 0x136   :  { %1850 = vmatprep.subr.bf16.mxu1 %v1849_v13  ;;  %1318 = vmatmul.mubr.f32.gmra.mrb[4].mxu0 %v1239_v52 }
 0x137   :  { %v1406_v38 = vsel %vm1402_vm6, %v2563_v20, %v2568_v56  ;;  %v1405_v36 = vsel %vm1402_vm6, %v2562_v17, %v2567_v45  ;;  %1852 = vmatpush1.bf16.msra.mxu1 %v1851_v44  ;;  %v2576_v29 = vpop.permute.xlu1 %2575  ;;  %v1421_v11 = vsel %vm1402_vm6, %v2567_v45, %v2562_v17  ;;  %v1422_v34 = vsel %vm1402_vm6, %v2568_v56, %v2563_v20 }
 0x138   :  { %v1979_v10 = vpack.c.bf16 %v1406_v38, %v1405_v36  ;;  %v2578_v43 = vunpack.i.h.bf16 %v2576_v29  ;;  %v2577_v33 = vunpack.i.l.bf16 %v2576_v29  ;;  %v2571_v53 = vpop.permute.xlu0 %2570  ;;  %v1977_v51 = vpack.c.bf16 %v1422_v34, %v1421_v11  ;;  %625 = vmatmul.mubr.f32.gmra.mrb[6].mxu1 %v541_v18  ;;  %1323 = vmatprep.mubr.f32.mxu0 %v2830_v0 }
 0x139   :  { %v2573_v8 = vunpack.i.h.bf16 %v2571_v53  ;;  %v2572_v42 = vunpack.i.l.bf16 %v2571_v53  ;;  %805 = vmatprep.mubr.f32.mxu1 %v2830_v0 }
 0x13a   :  { %1978 = vmatprep.subr.bf16.mxu0 %v1977_v51  ;;  %1324 = vmatmul.mubr.f32.gmra.mrb[6].mxu0 %v1240_v26 }
 0x13b   :  { %v725_v55 = vsel %vm703_vm5, %v2578_v43, %v2573_v8  ;;  %v724_v49 = vsel %vm703_vm5, %v2577_v33, %v2572_v42  ;;  %1980 = vmatpush1.bf16.msra.mxu0 %v1979_v10  ;;  %v2586_v46 = vpop.permute.xlu1 %2585  ;;  %v708_v15 = vsel %vm703_vm5, %v2572_v42, %v2577_v33  ;;  %v709_v31 = vsel %vm703_vm5, %v2573_v8, %v2578_v43 }
 0x13c   :  { %v1855_v35 = vpack.c.bf16 %v725_v55, %v724_v49  ;;  %v2588_v39 = vunpack.i.h.bf16 %v2586_v46  ;;  %v2587_v1 = vunpack.i.l.bf16 %v2586_v46  ;;  %v2581_v23 = vpop.permute.xlu0 %2580  ;;  %v1853_v60 = vpack.c.bf16 %v709_v31, %v708_v15  ;;  %1504 = vmatprep.mubr.f32.mxu0 %v2830_v0 }
 0x13d   :  { %v2583_v14 = vunpack.i.h.bf16 %v2581_v23  ;;  %v2582_v27 = vunpack.i.l.bf16 %v2581_v23 }
 0x13e   :  { %1854 = vmatprep.subr.bf16.mxu1 %v1853_v60 }
 0x13f   :  { %v1408_v61 = vsel %vm1402_vm6, %v2583_v14, %v2588_v39  ;;  %v1407_v9 = vsel %vm1402_vm6, %v2582_v27, %v2587_v1  ;;  %1856 = vmatpush1.bf16.msra.mxu1 %v1855_v35  ;;  %v2596_v48 = vpop.permute.xlu1 %2595  ;;  %v1423_v32 = vsel %vm1402_vm6, %v2587_v1, %v2582_v27  ;;  %v1424_v4 = vsel %vm1402_vm6, %v2588_v39, %v2583_v14 }
 0x140   :  { %v1983_v59 = vpack.c.bf16 %v1408_v61, %v1407_v9  ;;  %v2598_v24 = vunpack.i.h.bf16 %v2596_v48  ;;  %v2597_v47 = vunpack.i.l.bf16 %v2596_v48  ;;  %v2591_v50 = vpop.permute.xlu0 %2590  ;;  %v1981_v57 = vpack.c.bf16 %v1424_v4, %v1423_v32 }
 0x141   :  { %v2593_v19 = vunpack.i.h.bf16 %v2591_v50  ;;  %v2592_v2 = vunpack.i.l.bf16 %v2591_v50 }
 0x142   :  { %1982 = vmatprep.subr.bf16.mxu0 %v1981_v57 }
 0x143   :  { %v727_v63 = vsel %vm703_vm5, %v2598_v24, %v2593_v19  ;;  %v726_v5 = vsel %vm703_vm5, %v2597_v47, %v2592_v2  ;;  %1984 = vmatpush1.bf16.msra.mxu0 %v1983_v59  ;;  %v2606_v22 = vpop.permute.xlu1 %2605  ;;  %v710_v25 = vsel %vm703_vm5, %v2592_v2, %v2597_v47  ;;  %v711_v40 = vsel %vm703_vm5, %v2593_v19, %v2598_v24 }
 0x144   :  { %v1859_v7 = vpack.c.bf16 %v727_v63, %v726_v5  ;;  %v2608_v16 = vunpack.i.h.bf16 %v2606_v22  ;;  %v2607_v58 = vunpack.i.l.bf16 %v2606_v22  ;;  %v2601_v62 = vpop.permute.xlu0 %2600  ;;  %v1857_v28 = vpack.c.bf16 %v711_v40, %v710_v25 }
 0x145   :  { %v2603_v6 = vunpack.i.h.bf16 %v2601_v62  ;;  %v2602_v12 = vunpack.i.l.bf16 %v2601_v62 }
 0x146   :  { %1858 = vmatprep.subr.bf16.mxu1 %v1857_v28 }
 0x147   :  { %v1410_v54 = vsel %vm1402_vm6, %v2603_v6, %v2608_v16  ;;  %v1409_v37 = vsel %vm1402_vm6, %v2602_v12, %v2607_v58  ;;  %1860 = vmatpush1.bf16.msra.mxu1 %v1859_v7  ;;  %v2616_v21 = vpop.permute.xlu1 %2615  ;;  %v1425_v3 = vsel %vm1402_vm6, %v2607_v58, %v2602_v12  ;;  %v1426_v52 = vsel %vm1402_vm6, %v2608_v16, %v2603_v6 }
 0x148   :  { %v1987_v44 = vpack.c.bf16 %v1410_v54, %v1409_v37  ;;  %v2618_v56 = vunpack.i.h.bf16 %v2616_v21  ;;  %v2617_v45 = vunpack.i.l.bf16 %v2616_v21  ;;  %v2611_v41 = vpop.permute.xlu0 %2610  ;;  %v1985_v13 = vpack.c.bf16 %v1426_v52, %v1425_v3 }
 0x149   :  { %v2613_v20 = vunpack.i.h.bf16 %v2611_v41  ;;  %v2612_v17 = vunpack.i.l.bf16 %v2611_v41 }
 0x14a   :  { %1986 = vmatprep.subr.bf16.mxu0 %v1985_v13 }
 0x14b   :  { %v729_v18 = vsel %vm703_vm5, %v2618_v56, %v2613_v20  ;;  %v728_v38 = vsel %vm703_vm5, %v2617_v45, %v2612_v17  ;;  %1988 = vmatpush1.bf16.msra.mxu0 %v1987_v44  ;;  %v2626_v36 = vpop.permute.xlu1 %2625  ;;  %v712_v29 = vsel %vm703_vm5, %v2612_v17, %v2617_v45  ;;  %v713_v11 = vsel %vm703_vm5, %v2613_v20, %v2618_v56 }
 0x14c   :  { %v1863_v34 = vpack.c.bf16 %v729_v18, %v728_v38  ;;  %v2628_v26 = vunpack.i.h.bf16 %v2626_v36  ;;  %v2627_v10 = vunpack.i.l.bf16 %v2626_v36  ;;  %v2621_v43 = vpop.permute.xlu0 %2620  ;;  %v1861_v33 = vpack.c.bf16 %v713_v11, %v712_v29 }
 0x14d   :  { %v2623_v53 = vunpack.i.h.bf16 %v2621_v43  ;;  %v2622_v51 = vunpack.i.l.bf16 %v2621_v43 }
 0x14e   :  { %1862 = vmatprep.subr.bf16.mxu1 %v1861_v33 }
 0x14f   :  { %v1412_v8 = vsel %vm1402_vm6, %v2623_v53, %v2628_v26  ;;  %v1411_v42 = vsel %vm1402_vm6, %v2622_v51, %v2627_v10  ;;  %1864 = vmatpush1.bf16.msra.mxu1 %v1863_v34  ;;  %v2636_v55 = vpop.permute.xlu1 %2635  ;;  %v1427_v49 = vsel %vm1402_vm6, %v2627_v10, %v2622_v51  ;;  %v1428_v46 = vsel %vm1402_vm6, %v2628_v26, %v2623_v53 }
 0x150   :  { %v1991_v15 = vpack.c.bf16 %v1412_v8, %v1411_v42  ;;  %v2638_v31 = vunpack.i.h.bf16 %v2636_v55  ;;  %v2637_v35 = vunpack.i.l.bf16 %v2636_v55  ;;  %v2631_v39 = vpop.permute.xlu0 %2630  ;;  %v1989_v1 = vpack.c.bf16 %v1428_v46, %v1427_v49 }
 0x151   :  { %v2633_v23 = vunpack.i.h.bf16 %v2631_v39  ;;  %v2632_v60 = vunpack.i.l.bf16 %v2631_v39 }
 0x152   :  { %1990 = vmatprep.subr.bf16.mxu0 %v1989_v1 }
 0x153   :  { %v731_v14 = vsel %vm703_vm5, %v2638_v31, %v2633_v23  ;;  %v730_v27 = vsel %vm703_vm5, %v2637_v35, %v2632_v60  ;;  %1992 = vmatpush1.bf16.msra.mxu0 %v1991_v15  ;;  %v2646_v61 = vpop.permute.xlu1 %2645  ;;  %v714_v9 = vsel %vm703_vm5, %v2632_v60, %v2637_v35  ;;  %v715_v48 = vsel %vm703_vm5, %v2633_v23, %v2638_v31 }
 0x154   :  { %v1867_v32 = vpack.c.bf16 %v731_v14, %v730_v27  ;;  %v2648_v4 = vunpack.i.h.bf16 %v2646_v61  ;;  %v2647_v59 = vunpack.i.l.bf16 %v2646_v61  ;;  %v2641_v24 = vpop.permute.xlu0 %2640  ;;  %v1865_v47 = vpack.c.bf16 %v715_v48, %v714_v9  ;;  %v737_v27 = vld [vmem:[#allocation2 + $0x60] sm:$0xff] }
 0x155   :  { %v2643_v50 = vunpack.i.h.bf16 %v2641_v24  ;;  %v2642_v57 = vunpack.i.l.bf16 %v2641_v24 }
 0x156   :  { %1866 = vmatprep.subr.bf16.mxu1 %v1865_v47 }
 0x157   :  { %v1414_v19 = vsel %vm1402_vm6, %v2643_v50, %v2648_v4  ;;  %v1413_v2 = vsel %vm1402_vm6, %v2642_v57, %v2647_v59  ;;  %1868 = vmatpush1.bf16.msra.mxu1 %v1867_v32  ;;  %v2656_v63 = vpop.permute.xlu1 %2655  ;;  %v1429_v5 = vsel %vm1402_vm6, %v2647_v59, %v2642_v57  ;;  %v1430_v22 = vsel %vm1402_vm6, %v2648_v4, %v2643_v50 }
 0x158   :  { %v1995_v25 = vpack.c.bf16 %v1414_v19, %v1413_v2  ;;  %v2658_v40 = vunpack.i.h.bf16 %v2656_v63  ;;  %v2657_v7 = vunpack.i.l.bf16 %v2656_v63  ;;  %v2651_v16 = vpop.permute.xlu0 %2650  ;;  %v1993_v58 = vpack.c.bf16 %v1430_v22, %v1429_v5  ;;  %v738_v63 = vld [vmem:[#allocation2 + $0x68] sm:$0xff]  ;;  %v1436_v5 = vld [vmem:[#allocation2 + $0xe0] sm:$0xff] }
 0x159   :  { %v2653_v62 = vunpack.i.h.bf16 %v2651_v16  ;;  %v2652_v28 = vunpack.i.l.bf16 %v2651_v16 }
 0x15a   :  { %1994 = vmatprep.subr.bf16.mxu0 %v1993_v58 }
 0x15b   :  { %v733_v6 = vsel %vm703_vm5, %v2658_v40, %v2653_v62  ;;  %v732_v12 = vsel %vm703_vm5, %v2657_v7, %v2652_v28  ;;  %1996 = vmatpush1.bf16.msra.mxu0 %v1995_v25  ;;  %v2666_v54 = vpop.permute.xlu1 %2665  ;;  %v716_v37 = vsel %vm703_vm5, %v2652_v28, %v2657_v7  ;;  %v717_v21 = vsel %vm703_vm5, %v2653_v62, %v2658_v40 }
 0x15c   :  { %v1871_v3 = vpack.c.bf16 %v733_v6, %v732_v12  ;;  %v2668_v52 = vunpack.i.h.bf16 %v2666_v54  ;;  %v2667_v44 = vunpack.i.l.bf16 %v2666_v54  ;;  %v2661_v56 = vpop.permute.xlu0 %2660  ;;  %v1869_v45 = vpack.c.bf16 %v717_v21, %v716_v37  ;;  %v739_v21 = vld [vmem:[#allocation2 + $0x70] sm:$0xff] }
 0x15d   :  { %v2663_v41 = vunpack.i.h.bf16 %v2661_v56  ;;  %v2662_v13 = vunpack.i.l.bf16 %v2661_v56 }
 0x15e   :  { %1870 = vmatprep.subr.bf16.mxu1 %v1869_v45 }
 0x15f   :  { %v1416_v20 = vsel %vm1402_vm6, %v2663_v41, %v2668_v52  ;;  %v1415_v17 = vsel %vm1402_vm6, %v2662_v13, %v2667_v44  ;;  %1872 = vmatpush1.bf16.msra.mxu1 %v1871_v3  ;;  %v2676_v18 = vpop.permute.xlu1 %2675  ;;  %v1431_v38 = vsel %vm1402_vm6, %v2667_v44, %v2662_v13  ;;  %v1432_v36 = vsel %vm1402_vm6, %v2668_v52, %v2663_v41  ;;  %v1437_v3 = vld [vmem:[#allocation2 + $0xe8] sm:$0xff] }
 0x160   :  { %v1999_v29 = vpack.c.bf16 %v1416_v20, %v1415_v17  ;;  %v2678_v11 = vunpack.i.h.bf16 %v2676_v18  ;;  %v2677_v34 = vunpack.i.l.bf16 %v2676_v18  ;;  %v2671_v26 = vpop.permute.xlu0 %2670  ;;  %v1997_v10 = vpack.c.bf16 %v1432_v36, %v1431_v38 }
 0x161   :  { %v2673_v43 = vunpack.i.h.bf16 %v2671_v26  ;;  %v2672_v33 = vunpack.i.l.bf16 %v2671_v26 }
 0x162   :  { %1998 = vmatprep.subr.bf16.mxu0 %v1997_v10 }
 0x163   :  { %v735_v53 = vsel %vm703_vm5, %v2678_v11, %v2673_v43  ;;  %v734_v51 = vsel %vm703_vm5, %v2677_v34, %v2672_v33  ;;  %2000 = vmatpush1.bf16.msra.mxu0 %v1999_v29  ;;  %v2686_v8 = vpop.permute.xlu1 %2685  ;;  %v718_v42 = vsel %vm703_vm5, %v2672_v33, %v2677_v34  ;;  %v719_v55 = vsel %vm703_vm5, %v2673_v43, %v2678_v11  ;;  %v740_v11 = vld [vmem:[#allocation2 + $0x78] sm:$0xff]  ;;  %v1438_v34 = vld [vmem:[#allocation2 + $0xf0] sm:$0xff] }
 0x164   :  { %v1875_v49 = vpack.c.bf16 %v735_v53, %v734_v51  ;;  %v2688_v46 = vunpack.i.h.bf16 %v2686_v8  ;;  %v2687_v15 = vunpack.i.l.bf16 %v2686_v8  ;;  %v2681_v31 = vpop.permute.xlu0 %2680  ;;  %v1873_v35 = vpack.c.bf16 %v719_v55, %v718_v42 }
 0x165   :  { %v2683_v39 = vunpack.i.h.bf16 %v2681_v31  ;;  %v2682_v1 = vunpack.i.l.bf16 %v2681_v31  ;;  %v1439_v31 = vld [vmem:[#allocation2 + $0xf8] sm:$0xff] }
 0x166   :  { %1874 = vmatprep.subr.bf16.mxu1 %v1873_v35 }
 0x167   :  { %v1418_v23 = vsel %vm1402_vm6, %v2683_v39, %v2688_v46  ;;  %v1417_v60 = vsel %vm1402_vm6, %v2682_v1, %v2687_v15  ;;  %1876 = vmatpush1.bf16.msra.mxu1 %v1875_v49  ;;  %v2696_v14 = vpop.permute.xlu1 %2695  ;;  %v1433_v61 = vsel %vm1402_vm6, %v2687_v15, %v2682_v1  ;;  %v1434_v9 = vsel %vm1402_vm6, %v2688_v46, %v2683_v39 }
 0x168   :  { %v2003_v48 = vpack.c.bf16 %v1418_v23, %v1417_v60  ;;  %v2698_v32 = vunpack.i.h.bf16 %v2696_v14  ;;  %v2697_v4 = vunpack.i.l.bf16 %v2696_v14  ;;  %v2691_v59 = vpop.permute.xlu0 %2690  ;;  %v2001_v24 = vpack.c.bf16 %v1434_v9, %v1433_v61 }
 0x169   :  { %v2693_v47 = vunpack.i.h.bf16 %v2691_v59  ;;  %v2692_v50 = vunpack.i.l.bf16 %v2691_v59 }
 0x16a   :  { %806 = vmatmul.mubr.f32.vlgmr.msra.gmra.mrb[0].mxu1 %v737_v27  ;;  %2002 = vmatprep.subr.bf16.mxu0 %v2001_v24 }
 0x16b   :  { %v1603_v57 = vsel %vm1601_vm7, %v2693_v47, %v2698_v32  ;;  %v1602_v19 = vsel %vm1601_vm7, %v2692_v50, %v2697_v4  ;;  %2004 = vmatpush1.bf16.msra.mxu0 %v2003_v48  ;;  %v2706_v2 = vpop.permute.xlu1 %2705  ;;  %811 = vmatprep.mubr.f32.mxu1 %v2830_v0  ;;  %v1618_v22 = vsel %vm1601_vm7, %v2697_v4, %v2692_v50 }
 0x16c   :  { %v2007_v25 = vpack.c.bf16 %v1603_v57, %v1602_v19  ;;  %v2708_v40 = vunpack.i.h.bf16 %v2706_v2  ;;  %v2707_v7 = vunpack.i.l.bf16 %v2706_v2  ;;  %v2701_v16 = vpop.permute.xlu0 %2700  ;;  %v1619_v58 = vsel %vm1601_vm7, %v2698_v32, %v2693_v47 }
 0x16d   :  { %v2703_v62 = vunpack.i.h.bf16 %v2701_v16  ;;  %v2702_v28 = vunpack.i.l.bf16 %v2701_v16  ;;  %v2005_v6 = vpack.c.bf16 %v1619_v58, %v1618_v22 }
 0x16e   :  { %812 = vmatmul.mubr.f32.gmra.mrb[2].mxu1 %v738_v63  ;;  %1505 = vmatmul.mubr.f32.vlgmr.msra.gmra.mrb[0].mxu0 %v1436_v5 }
 0x16f   :  { %v1605_v12 = vsel %vm1601_vm7, %v2703_v62, %v2708_v40  ;;  %v1604_v54 = vsel %vm1601_vm7, %v2702_v28, %v2707_v7  ;;  %2006 = vmatprep.subr.bf16.mxu0 %v2005_v6  ;;  %2037 = vmatprep.subr.bf16.mxu1 %v2005_v6  ;;  %v2716_v37 = vpop.permute.xlu1 %2715  ;;  %v1620_v52 = vsel %vm1601_vm7, %v2707_v7, %v2702_v28 }
 0x170   :  { %v2011_v44 = vpack.c.bf16 %v1605_v12, %v1604_v54  ;;  %2008 = vmatpush1.bf16.msra.mxu0 %v2007_v25  ;;  %2045 = vmatpush1.bf16.msra.mxu1 %v2007_v25  ;;  %v2718_v56 = vunpack.i.h.bf16 %v2716_v37  ;;  %v2717_v45 = vunpack.i.l.bf16 %v2716_v37  ;;  %v2711_v41 = vpop.permute.xlu0 %2710  ;;  %v1621_v13 = vsel %vm1601_vm7, %v2708_v40, %v2703_v62 }
 0x171   :  { %v2713_v20 = vunpack.i.h.bf16 %v2711_v41  ;;  %v2712_v17 = vunpack.i.l.bf16 %v2711_v41  ;;  %817 = vmatprep.mubr.f32.mxu1 %v2830_v0  ;;  %1510 = vmatprep.mubr.f32.mxu0 %v2830_v0  ;;  %v2009_v18 = vpack.c.bf16 %v1621_v13, %v1620_v52 }
 0x172   :  { %818 = vmatmul.mubr.f32.gmra.mrb[4].mxu1 %v739_v21  ;;  %1511 = vmatmul.mubr.f32.gmra.mrb[2].mxu0 %v1437_v3 }
 0x173   :  { %v1607_v38 = vsel %vm1601_vm7, %v2713_v20, %v2718_v56  ;;  %v1606_v36 = vsel %vm1601_vm7, %v2712_v17, %v2717_v45  ;;  %2010 = vmatprep.subr.bf16.mxu0 %v2009_v18  ;;  %2038 = vmatprep.subr.bf16.mxu1 %v2009_v18  ;;  %v2726_v29 = vpop.permute.xlu1 %2725  ;;  %v1622_v26 = vsel %vm1601_vm7, %v2717_v45, %v2712_v17 }
 0x174   :  { %v2015_v10 = vpack.c.bf16 %v1607_v38, %v1606_v36  ;;  %2012 = vmatpush1.bf16.msra.mxu0 %v2011_v44  ;;  %2046 = vmatpush1.bf16.msra.mxu1 %v2011_v44  ;;  %v2728_v43 = vunpack.i.h.bf16 %v2726_v29  ;;  %v2727_v33 = vunpack.i.l.bf16 %v2726_v29  ;;  %v2721_v53 = vpop.permute.xlu0 %2720  ;;  %v1623_v51 = vsel %vm1601_vm7, %v2718_v56, %v2713_v20 }
 0x175   :  { %v2723_v8 = vunpack.i.h.bf16 %v2721_v53  ;;  %v2722_v42 = vunpack.i.l.bf16 %v2721_v53  ;;  %823 = vmatprep.mubr.f32.mxu1 %v2830_v0  ;;  %1516 = vmatprep.mubr.f32.mxu0 %v2830_v0  ;;  %v2013_v55 = vpack.c.bf16 %v1623_v51, %v1622_v26  ;;  %v1636_v53 = vld [vmem:[#allocation2 + $0x108] sm:$0xff]  ;;  %v1638_v51 = vld [vmem:[#allocation2 + $0x118] sm:$0xff] }
 0x176   :  { %824 = vmatmul.mubr.f32.gmra.mrb[6].mxu1 %v740_v11  ;;  %1517 = vmatmul.mubr.f32.gmra.mrb[4].mxu0 %v1438_v34 }
 0x177   :  { %v1609_v49 = vsel %vm1601_vm7, %v2723_v8, %v2728_v43  ;;  %v1608_v46 = vsel %vm1601_vm7, %v2722_v42, %v2727_v33  ;;  %2014 = vmatprep.subr.bf16.mxu0 %v2013_v55  ;;  %2039 = vmatprep.subr.bf16.mxu1 %v2013_v55  ;;  %v2736_v15 = vpop.permute.xlu1 %2735  ;;  %v1624_v35 = vsel %vm1601_vm7, %v2727_v33, %v2722_v42  ;;  %v1637_v33 = vld [vmem:[#allocation2 + $0x110] sm:$0xff] }
 0x178   :  { %v2019_v39 = vpack.c.bf16 %v1609_v49, %v1608_v46  ;;  %2016 = vmatpush1.bf16.msra.mxu0 %v2015_v10  ;;  %2047 = vmatpush1.bf16.msra.mxu1 %v2015_v10  ;;  %v2738_v1 = vunpack.i.h.bf16 %v2736_v15  ;;  %v2737_v23 = vunpack.i.l.bf16 %v2736_v15  ;;  %v2731_v60 = vpop.permute.xlu0 %2730  ;;  %v1625_v14 = vsel %vm1601_vm7, %v2728_v43, %v2723_v8  ;;  %v1635_v43 = vld [vmem:[#allocation2 + $0x100] sm:$0xff] }
 0x179   :  { %v2733_v27 = vunpack.i.h.bf16 %v2731_v60  ;;  %v2732_v61 = vunpack.i.l.bf16 %v2731_v60  ;;  %1522 = vmatprep.mubr.f32.mxu0 %v2830_v0  ;;  %v2017_v9 = vpack.c.bf16 %v1625_v14, %v1624_v35  ;;  %1715 = vmatprep.mubr.f32.mxu1 %v2830_v0 }
 0x17a   :  { %1523 = vmatmul.mubr.f32.gmra.mrb[6].mxu0 %v1439_v31 }
 0x17b   :  { %v1611_v48 = vsel %vm1601_vm7, %v2733_v27, %v2738_v1  ;;  %v1610_v32 = vsel %vm1601_vm7, %v2732_v61, %v2737_v23  ;;  %2018 = vmatprep.subr.bf16.mxu0 %v2017_v9  ;;  %2040 = vmatprep.subr.bf16.mxu1 %v2017_v9  ;;  %v2746_v4 = vpop.permute.xlu1 %2745  ;;  %v1626_v59 = vsel %vm1601_vm7, %v2737_v23, %v2732_v61 }
 0x17c   :  { %v2023_v24 = vpack.c.bf16 %v1611_v48, %v1610_v32  ;;  %2020 = vmatpush1.bf16.msra.mxu0 %v2019_v39  ;;  %2048 = vmatpush1.bf16.msra.mxu1 %v2019_v39  ;;  %v2748_v47 = vunpack.i.h.bf16 %v2746_v4  ;;  %v2747_v50 = vunpack.i.l.bf16 %v2746_v4  ;;  %v2741_v57 = vpop.permute.xlu0 %2740  ;;  %v1627_v19 = vsel %vm1601_vm7, %v2738_v1, %v2733_v27 }
 0x17d   :  { %v2743_v2 = vunpack.i.h.bf16 %v2741_v57  ;;  %v2742_v63 = vunpack.i.l.bf16 %v2741_v57  ;;  %v2021_v5 = vpack.c.bf16 %v1627_v19, %v1626_v59  ;;  %1703 = vmatprep.mubr.f32.mxu0 %v2830_v0 }
 0x17f   :  { %v1613_v22 = vsel %vm1601_vm7, %v2743_v2, %v2748_v47  ;;  %v1612_v25 = vsel %vm1601_vm7, %v2742_v63, %v2747_v50  ;;  %2022 = vmatprep.subr.bf16.mxu0 %v2021_v5  ;;  %2041 = vmatprep.subr.bf16.mxu1 %v2021_v5  ;;  %v2756_v40 = vpop.permute.xlu1 %2755  ;;  %v1628_v7 = vsel %vm1601_vm7, %v2747_v50, %v2742_v63 }
 0x180   :  { %v2027_v16 = vpack.c.bf16 %v1613_v22, %v1612_v25  ;;  %2024 = vmatpush1.bf16.msra.mxu0 %v2023_v24  ;;  %2049 = vmatpush1.bf16.msra.mxu1 %v2023_v24  ;;  %v2758_v58 = vunpack.i.h.bf16 %v2756_v40  ;;  %v2757_v62 = vunpack.i.l.bf16 %v2756_v40  ;;  %v2751_v28 = vpop.permute.xlu0 %2750  ;;  %v1629_v6 = vsel %vm1601_vm7, %v2748_v47, %v2743_v2 }
 0x181   :  { %v2753_v12 = vunpack.i.h.bf16 %v2751_v28  ;;  %v2752_v54 = vunpack.i.l.bf16 %v2751_v28  ;;  %v2025_v37 = vpack.c.bf16 %v1629_v6, %v1628_v7 }
 0x183   :  { %v1615_v21 = vsel %vm1601_vm7, %v2753_v12, %v2758_v58  ;;  %v1614_v3 = vsel %vm1601_vm7, %v2752_v54, %v2757_v62  ;;  %2026 = vmatprep.subr.bf16.mxu0 %v2025_v37  ;;  %2042 = vmatprep.subr.bf16.mxu1 %v2025_v37  ;;  %v2766_v52 = vpop.permute.xlu1 %2765  ;;  %v1630_v44 = vsel %vm1601_vm7, %v2757_v62, %v2752_v54 }
 0x184   :  { %v2031_v56 = vpack.c.bf16 %v1615_v21, %v1614_v3  ;;  %2028 = vmatpush1.bf16.msra.mxu0 %v2027_v16  ;;  %2050 = vmatpush1.bf16.msra.mxu1 %v2027_v16  ;;  %v2768_v45 = vunpack.i.h.bf16 %v2766_v52  ;;  %v2767_v41 = vunpack.i.l.bf16 %v2766_v52  ;;  %v2761_v13 = vpop.permute.xlu0 %2760  ;;  %v1631_v20 = vsel %vm1601_vm7, %v2758_v58, %v2753_v12 }
 0x185   :  { %v2763_v17 = vunpack.i.h.bf16 %v2761_v13  ;;  %v2762_v18 = vunpack.i.l.bf16 %v2761_v13  ;;  %v2029_v38 = vpack.c.bf16 %v1631_v20, %v1630_v44 }
 0x187   :  { %v1617_v36 = vsel %vm1601_vm7, %v2763_v17, %v2768_v45  ;;  %v1616_v29 = vsel %vm1601_vm7, %v2762_v18, %v2767_v41  ;;  %2030 = vmatprep.subr.bf16.mxu0 %v2029_v38  ;;  %2043 = vmatprep.subr.bf16.mxu1 %v2029_v38  ;;  %v1632_v11 = vsel %vm1601_vm7, %v2767_v41, %v2762_v18 }
 0x188   :  { %v2035_v34 = vpack.c.bf16 %v1617_v36, %v1616_v29  ;;  %2032 = vmatpush1.bf16.msra.mxu0 %v2031_v56  ;;  %2051 = vmatpush1.bf16.msra.mxu1 %v2031_v56  ;;  %v1633_v26 = vsel %vm1601_vm7, %v2768_v45, %v2763_v17 }
 0x189   :  { %v2033_v10 = vpack.c.bf16 %v1633_v26, %v1632_v11 }
 0x18b   :  { %2034 = vmatprep.subr.bf16.mxu0 %v2033_v10  ;;  %2044 = vmatprep.subr.bf16.mxu1 %v2033_v10 }
 0x18c   :  { %2036 = vmatpush1.bf16.msra.mxu0 %v2035_v34  ;;  %2052 = vmatpush1.bf16.msra.mxu1 %v2035_v34 }
 0x18f   :  { %1704 = vmatmul.mubr.f32.vlgmr.msra.gmra.mrb[0].mxu0 %v1635_v43  ;;  %1716 = vmatmul.mubr.f32.vlgmr.msra.gmra.mrb[8].mxu1 %v1637_v33 }
 0x190   :  { %1709 = vmatprep.mubr.f32.mxu0 %v2830_v0  ;;  %1721 = vmatprep.mubr.f32.mxu1 %v2830_v0 }
 0x193   :  { %1710 = vmatmul.mubr.f32.gmra.mrb[2].mxu0 %v1636_v53  ;;  %1722 = vmatmul.mubr.f32.gmra.mrb[10].mxu1 %v1638_v51 }
 0x23d   :  { %v807_v8 = vpop.f32.mrb[0].mxu1 }
 0x23e   :  { %v809_v30 = vpop.f32.mrb[1].mxu1 }
 0x241   :  { %v813_v42 = vpop.f32.mrb[2].mxu1 }
 0x242   :  { %v815_v55 = vpop.f32.mrb[3].mxu1 }
 0x245   :  { %v819_v49 = vpop.f32.mrb[4].mxu1 }
 0x246   :  { %v821_v46 = vpop.f32.mrb[5].mxu1 }
 0x249   :  { %v825_v15 = vpop.f32.mrb[6].mxu1  ;;  %v1518_v31 = vpop.f32.mrb[4].mxu0 }
 0x24a   :  { %v2057_v35 = vadd.f32 %v1518_v31, %v819_v49  ;;  %v827_v39 = vpop.f32.mrb[7].mxu1  ;;  %v1520_v1 = vpop.f32.mrb[5].mxu0 }
 0x24b   :  { %v2059_v23 = vadd.f32 %v1520_v1, %v821_v46 }
 0x24d   :  { %v1524_v60 = vpop.f32.mrb[6].mxu0 }
 0x24e   :  { %v2061_v14 = vadd.f32 %v1524_v60, %v825_v15  ;;  %v1526_v27 = vpop.f32.mrb[7].mxu0 }
 0x24f   :  { %v2063_v0 = vadd.f32 %v1526_v27, %v827_v39 }
 0x262   :  { %v1705_v61 = vpop.f32.mrb[0].mxu0  ;;  %v1717_v9 = vpop.f32.mrb[8].mxu1 }
 0x263   :  { %v2053_v48 = vadd.f32 %v1705_v61, %v807_v8  ;;  %v2058_v32 = vadd.f32 %v2057_v35, %v1717_v9  ;;  %v1707_v4 = vpop.f32.mrb[1].mxu0  ;;  %v1719_v59 = vpop.f32.mrb[9].mxu1 }
 0x264   :  { %v2054_v24 = vadd.f32 %v1707_v4, %v809_v30  ;;  %v2060_v47 = vadd.f32 %v2059_v23, %v1719_v59 }
 0x265   :  { %1736 = vst [vmem:[%s4168_s2] sm:$0xff] %v2053_v48  ;;  %1740 = vst [vmem:[%s4168_s2 + $0x20] sm:$0xff] %v2058_v32 }
 0x266   :  { %1737 = vst [vmem:[%s4168_s2 + $0x8] sm:$0xff] %v2054_v24  ;;  %1741 = vst [vmem:[%s4168_s2 + $0x28] sm:$0xff] %v2060_v47  ;;  %v1711_v50 = vpop.f32.mrb[2].mxu0  ;;  %v1723_v57 = vpop.f32.mrb[10].mxu1 }
 0x267   :  { %v2055_v19 = vadd.f32 %v1711_v50, %v813_v42  ;;  %v2062_v2 = vadd.f32 %v2061_v14, %v1723_v57  ;;  %v1713_v63 = vpop.f32.mrb[3].mxu0  ;;  %v1725_v5 = vpop.f32.mrb[11].mxu1 }
 0x268   :  { %v2056_v22 = vadd.f32 %v1713_v63, %v815_v55  ;;  %v2064_v25 = vadd.f32 %v2063_v0, %v1725_v5 }
 0x269   :  { %1738 = vst [vmem:[%s4168_s2 + $0x10] sm:$0xff] %v2055_v19  ;;  %1742 = vst [vmem:[%s4168_s2 + $0x30] sm:$0xff] %v2062_v2 }
 0x26a   :  { %1739 = vst [vmem:[%s4168_s2 + $0x18] sm:$0xff] %v2056_v22  ;;  %1743 = vst [vmem:[%s4168_s2 + $0x38] sm:$0xff] %v2064_v25 }
 0x26b   :  { %1748 = vsyncpa [#allocation3], 1 }

</bundles_post_ra>
